<compile_context>
chip_gen: v5e
topology: v5e:2x2
jax: 0.10.0
libtpu: 0.0.40
codegen_flags: <defaults>
</compile_context>

<pallas_src>
import functools

import jax
import jax.numpy as jnp
from jax.experimental import pallas as pl
from jax.experimental.pallas import tpu as pltpu


def _lstm_kernel(x_ref, wih_ref, whh_ref, b_ref, len_ref, out_ref,
                 *, batch, seq_len, hidden_size):
    B, T, H = batch, seq_len, hidden_size

    # ---- Prologue: input projection for all timesteps in one MXU matmul.
    # (B*T, D) @ (D, 4H) + (1, 4H)  ->  (B*T, 4H)  ->  (B, T, 4H)
    gx = jnp.dot(x_ref[...], wih_ref[...],
                 preferred_element_type=jnp.float32) + b_ref[...]
    gx = gx.reshape(B, T, 4 * H)

    whh = whh_ref[...]            # (H, 4H), stays resident across the loop
    lens = len_ref[...]           # (B, 1) int32, loaded once

    h = jnp.zeros((B, H), jnp.float32)
    c = jnp.zeros((B, H), jnp.float32)

    # ---- Recurrence: fully unrolled (T is small & static); h/c live in vregs.
    for t in range(T):
        gates = gx[:, t, :] + jnp.dot(h, whh,
                                      preferred_element_type=jnp.float32)  # (B, 4H)

        sig = jax.nn.sigmoid(gates)   # one full-width EUP launch
        tnh = jnp.tanh(gates)         # one full-width EUP launch
        i_g = sig[:, 0 * H:1 * H]
        f_g = sig[:, 1 * H:2 * H]
        g_g = tnh[:, 2 * H:3 * H]
        o_g = sig[:, 3 * H:4 * H]

        c_new = f_g * c + i_g * g_g
        h_new = o_g * jnp.tanh(c_new)

        valid = lens > t              # (B, 1) bool; broadcasts over hidden dim
        c = jnp.where(valid, c_new, c)    # freeze state past lengths[b] (packed semantics)
        h = jnp.where(valid, h_new, h)

        # Lane-dense output slab: step t occupies lanes [t*H, (t+1)*H).
        out_ref[:, t * H:(t + 1) * H] = jnp.where(valid, h_new, 0.0).astype(out_ref.dtype)


def auvi_gate_net_forward(x, lengths, w_ih, w_hh, b_ih, b_hh):
    """x: (B, T, D) float32, lengths: (B,) int.  Returns (B, T, H) float32."""
    B, T, D = x.shape
    H = w_hh.shape[1]
    assert w_ih.shape == (4 * H, D) and w_hh.shape == (4 * H, H)

    # Parameter prep (tiny, once per call). Weight transposes give (in, 4H) layouts
    # so the kernel's matmuls are plain row-major dots.
    x_flat = x.astype(jnp.float32).reshape(B * T, D)             # metadata-only reshape
    wih_t = jnp.transpose(w_ih).astype(jnp.float32)              # (D, 4H)
    whh_t = jnp.transpose(w_hh).astype(jnp.float32)              # (H, 4H)
    bias = (b_ih + b_hh).reshape(1, 4 * H).astype(jnp.float32)   # (1, 4H)
    len2d = lengths.astype(jnp.int32).reshape(B, 1)              # (B, 1)

    kernel = functools.partial(_lstm_kernel, batch=B, seq_len=T, hidden_size=H)

    out_flat = pl.pallas_call(
        kernel,
        out_shape=jax.ShapeDtypeStruct((B, T * H), jnp.float32),
        grid_spec=pltpu.PrefetchScalarGridSpec(
            num_scalar_prefetch=0,
            grid=(1,),                                            # whole problem in VMEM
            in_specs=[
                pl.BlockSpec((B * T, D), lambda i: (0, 0)),       # x (batch-first, flattened)
                pl.BlockSpec((D, 4 * H), lambda i: (0, 0)),       # W_ih^T
                pl.BlockSpec((H, 4 * H), lambda i: (0, 0)),       # W_hh^T
                pl.BlockSpec((1, 4 * H), lambda i: (0, 0)),       # b_ih + b_hh
                pl.BlockSpec((B, 1), lambda i: (0, 0)),           # lengths
            ],
            out_specs=pl.BlockSpec((B, T * H), lambda i: (0, 0)), # lane-dense output slab
        ),
        compiler_params=pltpu.CompilerParams(
            dimension_semantics=("arbitrary",),
        ),
    )(x_flat, wih_t, whh_t, bias, len2d)

    # (B, T*H) -> (B, T, H) is a pure row-major metadata reshape (no copy).
    # TODO(synk): pad_packed_sequence truncates the time dim to max(lengths)
    # (data-dependent); we return the full static T, identical when max(lengths) == T.
    return out_flat.reshape(B, T, H)


def _reference_lstm(x, lengths, w_ih, w_hh, b_ih, b_hh):
    """Pure-JAX reference (matches PyTorch packed-LSTM output semantics)."""
    B, T, D = x.shape
    H = w_hh.shape[1]

    def step(carry, inp):
        h, c = carry
        x_t, t = inp
        gates = x_t @ w_ih.T + h @ w_hh.T + b_ih + b_hh
        i = jax.nn.sigmoid(gates[:, 0 * H:1 * H])
        f = jax.nn.sigmoid(gates[:, 1 * H:2 * H])
        g = jnp.tanh(gates[:, 2 * H:3 * H])
        o = jax.nn.sigmoid(gates[:, 3 * H:4 * H])
        c_new = f * c + i * g
        h_new = o * jnp.tanh(c_new)
        valid = (lengths > t)[:, None]
        c = jnp.where(valid, c_new, c)
        h = jnp.where(valid, h_new, h)
        out = jnp.where(valid, h_new, 0.0)
        return (h, c), out

    h0 = jnp.zeros((B, H), jnp.float32)
    c0 = jnp.zeros((B, H), jnp.float32)
    xs = (jnp.transpose(x, (1, 0, 2)), jnp.arange(T))
    _, outs = jax.lax.scan(step, (h0, c0), xs)
    return jnp.transpose(outs, (1, 0, 2))


if __name__ == "__main__":
    # Small shapes consistent with the module: batch=2, seq=8, in_size=16, hidden=32
    B, T, D, H = 2, 8, 16, 32

    key = jax.random.PRNGKey(0)
    kx, k1, k2, k3, k4 = jax.random.split(key, 5)

    x = jax.random.normal(kx, (B, T, D), dtype=jnp.float32)
    # Ensure max(lengths) == T so the output seq dim matches pad_packed_sequence.
    lengths = jnp.array([T, T - 3], dtype=jnp.int32)

    # Deterministic parameter init, matching PyTorch LSTM's U(-1/sqrt(H), 1/sqrt(H)).
    bound = 1.0 / (H ** 0.5)
    w_ih = jax.random.uniform(k1, (4 * H, D), jnp.float32, -bound, bound)
    w_hh = jax.random.uniform(k2, (4 * H, H), jnp.float32, -bound, bound)
    b_ih = jax.random.uniform(k3, (4 * H,), jnp.float32, -bound, bound)
    b_hh = jax.random.uniform(k4, (4 * H,), jnp.float32, -bound, bound)

    out = auvi_gate_net_forward(x, lengths, w_ih, w_hh, b_ih, b_hh)
    out = jax.block_until_ready(out)

    ref = _reference_lstm(x, lengths, w_ih, w_hh, b_ih, b_hh)
    assert out.shape == (B, T, H)
    assert jnp.allclose(out, ref, atol=1e-5, rtol=1e-5), "mismatch vs reference"

    print("KERNEL_OK")
</pallas_src>

<mosaic_0001>
module attributes {stable_mosaic.version = 11 : i64} {
  func.func @_lstm_kernel(%arg0: i32, %arg1: memref<16x16xf32, #tpu.memory_space<vmem>>, %arg2: memref<16x128xf32, #tpu.memory_space<vmem>>, %arg3: memref<32x128xf32, #tpu.memory_space<vmem>>, %arg4: memref<1x128xf32, #tpu.memory_space<vmem>>, %arg5: memref<2x1xi32, #tpu.memory_space<vmem>>, %arg6: memref<2x256xf32, #tpu.memory_space<vmem>>) attributes {dimension_semantics = [#tpu.dimension_semantics<arbitrary>], iteration_bounds = array<i64: 1>, scalar_prefetch = 0 : i64, scratch_operands = 0 : i64, tpu.core_type = #tpu.core_type<tc>, window_params = [{pipeline_mode = #tpu.pipeline_mode<synchronous>, transform_indices = @transform_0, window_bounds = array<i64: 16, 16>}, {pipeline_mode = #tpu.pipeline_mode<synchronous>, transform_indices = @transform_1, window_bounds = array<i64: 16, 128>}, {pipeline_mode = #tpu.pipeline_mode<synchronous>, transform_indices = @transform_2, window_bounds = array<i64: 32, 128>}, {pipeline_mode = #tpu.pipeline_mode<synchronous>, transform_indices = @transform_3, window_bounds = array<i64: 1, 128>}, {pipeline_mode = #tpu.pipeline_mode<synchronous>, transform_indices = @transform_4, window_bounds = array<i64: 2, 1>}, {pipeline_mode = #tpu.pipeline_mode<synchronous>, transform_indices = @transform_5, window_bounds = array<i64: 2, 256>}]} {
    %c0 = arith.constant 0 : index
    %c0_0 = arith.constant 0 : index
    %0 = vector.load %arg1[%c0, %c0_0] : memref<16x16xf32, #tpu.memory_space<vmem>>, vector<16x16xf32>
    %c0_1 = arith.constant 0 : index
    %c0_2 = arith.constant 0 : index
    %1 = vector.load %arg2[%c0_1, %c0_2] : memref<16x128xf32, #tpu.memory_space<vmem>>, vector<16x128xf32>
    %cst = arith.constant dense<0.000000e+00> : vector<16x128xf32>
    %2 = tpu.matmul %0, %1, %cst {dimension_numbers = #tpu.dot_dimension_numbers<[1], [0], [0], [1], [0, 0, 1, 1], [], []>} : vector<16x16xf32>, vector<16x128xf32>, vector<16x128xf32> -> vector<16x128xf32>
    %c0_3 = arith.constant 0 : index
    %c0_4 = arith.constant 0 : index
    %3 = vector.load %arg4[%c0_3, %c0_4] : memref<1x128xf32, #tpu.memory_space<vmem>>, vector<1x128xf32>
    %4 = vector.broadcast %3 : vector<1x128xf32> to vector<16x128xf32>
    %5 = arith.addf %2, %4 : vector<16x128xf32>
    %6 = vector.shape_cast %5 : vector<16x128xf32> to vector<2x8x128xf32>
    %c0_5 = arith.constant 0 : index
    %c0_6 = arith.constant 0 : index
    %7 = vector.load %arg3[%c0_5, %c0_6] : memref<32x128xf32, #tpu.memory_space<vmem>>, vector<32x128xf32>
    %c0_7 = arith.constant 0 : index
    %c0_8 = arith.constant 0 : index
    %8 = vector.load %arg5[%c0_7, %c0_8] : memref<2x1xi32, #tpu.memory_space<vmem>>, vector<2x1xi32>
    %cst_9 = arith.constant 0.000000e+00 : f32
    %9 = vector.broadcast %cst_9 : f32 to vector<2x32xf32>
    %cst_10 = arith.constant 0.000000e+00 : f32
    %10 = vector.broadcast %cst_10 : f32 to vector<2x32xf32>
    %11 = vector.extract_strided_slice %6 {offsets = [0, 0, 0], sizes = [2, 1, 128], strides = [1, 1, 1]} : vector<2x8x128xf32> to vector<2x1x128xf32>
    %12 = vector.shape_cast %11 : vector<2x1x128xf32> to vector<2x128xf32>
    %cst_11 = arith.constant dense<0.000000e+00> : vector<2x128xf32>
    %13 = tpu.matmul %9, %7, %cst_11 {dimension_numbers = #tpu.dot_dimension_numbers<[1], [0], [0], [1], [0, 0, 1, 1], [], []>} : vector<2x32xf32>, vector<32x128xf32>, vector<2x128xf32> -> vector<2x128xf32>
    %14 = arith.addf %12, %13 : vector<2x128xf32>
    %15 = arith.negf %14 : vector<2x128xf32>
    %16 = math.exp %15 : vector<2x128xf32>
    %cst_12 = arith.constant 1.000000e+00 : f32
    %17 = vector.broadcast %cst_12 : f32 to vector<2x128xf32>
    %18 = arith.addf %17, %16 : vector<2x128xf32>
    %19 = arith.divf %17, %18 : vector<2x128xf32>
    %20 = math.tanh %14 : vector<2x128xf32>
    %21 = vector.extract_strided_slice %19 {offsets = [0, 0], sizes = [2, 32], strides = [1, 1]} : vector<2x128xf32> to vector<2x32xf32>
    %22 = vector.extract_strided_slice %19 {offsets = [0, 32], sizes = [2, 32], strides = [1, 1]} : vector<2x128xf32> to vector<2x32xf32>
    %23 = vector.extract_strided_slice %20 {offsets = [0, 64], sizes = [2, 32], strides = [1, 1]} : vector<2x128xf32> to vector<2x32xf32>
    %24 = vector.extract_strided_slice %19 {offsets = [0, 96], sizes = [2, 32], strides = [1, 1]} : vector<2x128xf32> to vector<2x32xf32>
    %25 = arith.mulf %22, %10 : vector<2x32xf32>
    %26 = arith.mulf %21, %23 : vector<2x32xf32>
    %27 = arith.addf %25, %26 : vector<2x32xf32>
    %28 = math.tanh %27 : vector<2x32xf32>
    %29 = arith.mulf %24, %28 : vector<2x32xf32>
    %c0_i32 = arith.constant 0 : i32
    %30 = vector.broadcast %c0_i32 : i32 to vector<2x1xi32>
    %31 = arith.cmpi sgt, %8, %30 : vector<2x1xi32>
    %32 = vector.shape_cast %31 : vector<2x1xi1> to vector<2x1xi1>
    %33 = vector.broadcast %32 : vector<2x1xi1> to vector<2x32xi1>
    %34 = arith.select %33, %27, %10 : vector<2x32xi1>, vector<2x32xf32>
    %35 = vector.shape_cast %31 : vector<2x1xi1> to vector<2x1xi1>
    %36 = vector.broadcast %35 : vector<2x1xi1> to vector<2x32xi1>
    %37 = arith.select %36, %29, %9 : vector<2x32xi1>, vector<2x32xf32>
    %cst_13 = arith.constant 0.000000e+00 : f32
    %38 = vector.shape_cast %31 : vector<2x1xi1> to vector<2x1xi1>
    %39 = vector.broadcast %38 : vector<2x1xi1> to vector<2x32xi1>
    %40 = vector.broadcast %cst_13 : f32 to vector<2x32xf32>
    %41 = arith.select %39, %29, %40 : vector<2x32xi1>, vector<2x32xf32>
    %c0_14 = arith.constant 0 : index
    %c0_15 = arith.constant 0 : index
    %42 = vector.load %arg6[%c0_14, %c0_15] : memref<2x256xf32, #tpu.memory_space<vmem>>, vector<2x32xf32>
    tpu.vector_store %arg6[%c0_14, %c0_15], %41 {strides = array<i32>} : memref<2x256xf32, #tpu.memory_space<vmem>>, vector<2x32xf32>,
    %43 = vector.extract_strided_slice %6 {offsets = [0, 1, 0], sizes = [2, 1, 128], strides = [1, 1, 1]} : vector<2x8x128xf32> to vector<2x1x128xf32>
    %44 = vector.shape_cast %43 : vector<2x1x128xf32> to vector<2x128xf32>
    %cst_16 = arith.constant dense<0.000000e+00> : vector<2x128xf32>
    %45 = tpu.matmul %37, %7, %cst_16 {dimension_numbers = #tpu.dot_dimension_numbers<[1], [0], [0], [1], [0, 0, 1, 1], [], []>} : vector<2x32xf32>, vector<32x128xf32>, vector<2x128xf32> -> vector<2x128xf32>
    %46 = arith.addf %44, %45 : vector<2x128xf32>
    %47 = arith.negf %46 : vector<2x128xf32>
    %48 = math.exp %47 : vector<2x128xf32>
    %cst_17 = arith.constant 1.000000e+00 : f32
    %49 = vector.broadcast %cst_17 : f32 to vector<2x128xf32>
    %50 = arith.addf %49, %48 : vector<2x128xf32>
    %51 = arith.divf %49, %50 : vector<2x128xf32>
    %52 = math.tanh %46 : vector<2x128xf32>
    %53 = vector.extract_strided_slice %51 {offsets = [0, 0], sizes = [2, 32], strides = [1, 1]} : vector<2x128xf32> to vector<2x32xf32>
    %54 = vector.extract_strided_slice %51 {offsets = [0, 32], sizes = [2, 32], strides = [1, 1]} : vector<2x128xf32> to vector<2x32xf32>
    %55 = vector.extract_strided_slice %52 {offsets = [0, 64], sizes = [2, 32], strides = [1, 1]} : vector<2x128xf32> to vector<2x32xf32>
    %56 = vector.extract_strided_slice %51 {offsets = [0, 96], sizes = [2, 32], strides = [1, 1]} : vector<2x128xf32> to vector<2x32xf32>
    %57 = arith.mulf %54, %34 : vector<2x32xf32>
    %58 = arith.mulf %53, %55 : vector<2x32xf32>
    %59 = arith.addf %57, %58 : vector<2x32xf32>
    %60 = math.tanh %59 : vector<2x32xf32>
    %61 = arith.mulf %56, %60 : vector<2x32xf32>
    %c1_i32 = arith.constant 1 : i32
    %62 = vector.broadcast %c1_i32 : i32 to vector<2x1xi32>
    %63 = arith.cmpi sgt, %8, %62 : vector<2x1xi32>
    %64 = vector.shape_cast %63 : vector<2x1xi1> to vector<2x1xi1>
    %65 = vector.broadcast %64 : vector<2x1xi1> to vector<2x32xi1>
    %66 = arith.select %65, %59, %34 : vector<2x32xi1>, vector<2x32xf32>
    %67 = vector.shape_cast %63 : vector<2x1xi1> to vector<2x1xi1>
    %68 = vector.broadcast %67 : vector<2x1xi1> to vector<2x32xi1>
    %69 = arith.select %68, %61, %37 : vector<2x32xi1>, vector<2x32xf32>
    %cst_18 = arith.constant 0.000000e+00 : f32
    %70 = vector.shape_cast %63 : vector<2x1xi1> to vector<2x1xi1>
    %71 = vector.broadcast %70 : vector<2x1xi1> to vector<2x32xi1>
    %72 = vector.broadcast %cst_18 : f32 to vector<2x32xf32>
    %73 = arith.select %71, %61, %72 : vector<2x32xi1>, vector<2x32xf32>
    %c0_19 = arith.constant 0 : index
    %c32 = arith.constant 32 : index
    %74 = vector.load %arg6[%c0_19, %c32] : memref<2x256xf32, #tpu.memory_space<vmem>>, vector<2x32xf32>
    tpu.vector_store %arg6[%c0_19, %c32], %73 {strides = array<i32>} : memref<2x256xf32, #tpu.memory_space<vmem>>, vector<2x32xf32>,
    %75 = vector.extract_strided_slice %6 {offsets = [0, 2, 0], sizes = [2, 1, 128], strides = [1, 1, 1]} : vector<2x8x128xf32> to vector<2x1x128xf32>
    %76 = vector.shape_cast %75 : vector<2x1x128xf32> to vector<2x128xf32>
    %cst_20 = arith.constant dense<0.000000e+00> : vector<2x128xf32>
    %77 = tpu.matmul %69, %7, %cst_20 {dimension_numbers = #tpu.dot_dimension_numbers<[1], [0], [0], [1], [0, 0, 1, 1], [], []>} : vector<2x32xf32>, vector<32x128xf32>, vector<2x128xf32> -> vector<2x128xf32>
    %78 = arith.addf %76, %77 : vector<2x128xf32>
    %79 = arith.negf %78 : vector<2x128xf32>
    %80 = math.exp %79 : vector<2x128xf32>
    %cst_21 = arith.constant 1.000000e+00 : f32
    %81 = vector.broadcast %cst_21 : f32 to vector<2x128xf32>
    %82 = arith.addf %81, %80 : vector<2x128xf32>
    %83 = arith.divf %81, %82 : vector<2x128xf32>
    %84 = math.tanh %78 : vector<2x128xf32>
    %85 = vector.extract_strided_slice %83 {offsets = [0, 0], sizes = [2, 32], strides = [1, 1]} : vector<2x128xf32> to vector<2x32xf32>
    %86 = vector.extract_strided_slice %83 {offsets = [0, 32], sizes = [2, 32], strides = [1, 1]} : vector<2x128xf32> to vector<2x32xf32>
    %87 = vector.extract_strided_slice %84 {offsets = [0, 64], sizes = [2, 32], strides = [1, 1]} : vector<2x128xf32> to vector<2x32xf32>
    %88 = vector.extract_strided_slice %83 {offsets = [0, 96], sizes = [2, 32], strides = [1, 1]} : vector<2x128xf32> to vector<2x32xf32>
    %89 = arith.mulf %86, %66 : vector<2x32xf32>
    %90 = arith.mulf %85, %87 : vector<2x32xf32>
    %91 = arith.addf %89, %90 : vector<2x32xf32>
    %92 = math.tanh %91 : vector<2x32xf32>
    %93 = arith.mulf %88, %92 : vector<2x32xf32>
    %c2_i32 = arith.constant 2 : i32
    %94 = vector.broadcast %c2_i32 : i32 to vector<2x1xi32>
    %95 = arith.cmpi sgt, %8, %94 : vector<2x1xi32>
    %96 = vector.shape_cast %95 : vector<2x1xi1> to vector<2x1xi1>
    %97 = vector.broadcast %96 : vector<2x1xi1> to vector<2x32xi1>
    %98 = arith.select %97, %91, %66 : vector<2x32xi1>, vector<2x32xf32>
    %99 = vector.shape_cast %95 : vector<2x1xi1> to vector<2x1xi1>
    %100 = vector.broadcast %99 : vector<2x1xi1> to vector<2x32xi1>
    %101 = arith.select %100, %93, %69 : vector<2x32xi1>, vector<2x32xf32>
    %cst_22 = arith.constant 0.000000e+00 : f32
    %102 = vector.shape_cast %95 : vector<2x1xi1> to vector<2x1xi1>
    %103 = vector.broadcast %102 : vector<2x1xi1> to vector<2x32xi1>
    %104 = vector.broadcast %cst_22 : f32 to vector<2x32xf32>
    %105 = arith.select %103, %93, %104 : vector<2x32xi1>, vector<2x32xf32>
    %c0_23 = arith.constant 0 : index
    %c64 = arith.constant 64 : index
    %106 = vector.load %arg6[%c0_23, %c64] : memref<2x256xf32, #tpu.memory_space<vmem>>, vector<2x32xf32>
    tpu.vector_store %arg6[%c0_23, %c64], %105 {strides = array<i32>} : memref<2x256xf32, #tpu.memory_space<vmem>>, vector<2x32xf32>,
    %107 = vector.extract_strided_slice %6 {offsets = [0, 3, 0], sizes = [2, 1, 128], strides = [1, 1, 1]} : vector<2x8x128xf32> to vector<2x1x128xf32>
    %108 = vector.shape_cast %107 : vector<2x1x128xf32> to vector<2x128xf32>
    %cst_24 = arith.constant dense<0.000000e+00> : vector<2x128xf32>
    %109 = tpu.matmul %101, %7, %cst_24 {dimension_numbers = #tpu.dot_dimension_numbers<[1], [0], [0], [1], [0, 0, 1, 1], [], []>} : vector<2x32xf32>, vector<32x128xf32>, vector<2x128xf32> -> vector<2x128xf32>
    %110 = arith.addf %108, %109 : vector<2x128xf32>
    %111 = arith.negf %110 : vector<2x128xf32>
    %112 = math.exp %111 : vector<2x128xf32>
    %cst_25 = arith.constant 1.000000e+00 : f32
    %113 = vector.broadcast %cst_25 : f32 to vector<2x128xf32>
    %114 = arith.addf %113, %112 : vector<2x128xf32>
    %115 = arith.divf %113, %114 : vector<2x128xf32>
    %116 = math.tanh %110 : vector<2x128xf32>
    %117 = vector.extract_strided_slice %115 {offsets = [0, 0], sizes = [2, 32], strides = [1, 1]} : vector<2x128xf32> to vector<2x32xf32>
    %118 = vector.extract_strided_slice %115 {offsets = [0, 32], sizes = [2, 32], strides = [1, 1]} : vector<2x128xf32> to vector<2x32xf32>
    %119 = vector.extract_strided_slice %116 {offsets = [0, 64], sizes = [2, 32], strides = [1, 1]} : vector<2x128xf32> to vector<2x32xf32>
    %120 = vector.extract_strided_slice %115 {offsets = [0, 96], sizes = [2, 32], strides = [1, 1]} : vector<2x128xf32> to vector<2x32xf32>
    %121 = arith.mulf %118, %98 : vector<2x32xf32>
    %122 = arith.mulf %117, %119 : vector<2x32xf32>
    %123 = arith.addf %121, %122 : vector<2x32xf32>
    %124 = math.tanh %123 : vector<2x32xf32>
    %125 = arith.mulf %120, %124 : vector<2x32xf32>
    %c3_i32 = arith.constant 3 : i32
    %126 = vector.broadcast %c3_i32 : i32 to vector<2x1xi32>
    %127 = arith.cmpi sgt, %8, %126 : vector<2x1xi32>
    %128 = vector.shape_cast %127 : vector<2x1xi1> to vector<2x1xi1>
    %129 = vector.broadcast %128 : vector<2x1xi1> to vector<2x32xi1>
    %130 = arith.select %129, %123, %98 : vector<2x32xi1>, vector<2x32xf32>
    %131 = vector.shape_cast %127 : vector<2x1xi1> to vector<2x1xi1>
    %132 = vector.broadcast %131 : vector<2x1xi1> to vector<2x32xi1>
    %133 = arith.select %132, %125, %101 : vector<2x32xi1>, vector<2x32xf32>
    %cst_26 = arith.constant 0.000000e+00 : f32
    %134 = vector.shape_cast %127 : vector<2x1xi1> to vector<2x1xi1>
    %135 = vector.broadcast %134 : vector<2x1xi1> to vector<2x32xi1>
    %136 = vector.broadcast %cst_26 : f32 to vector<2x32xf32>
    %137 = arith.select %135, %125, %136 : vector<2x32xi1>, vector<2x32xf32>
    %c0_27 = arith.constant 0 : index
    %c96 = arith.constant 96 : index
    %138 = vector.load %arg6[%c0_27, %c96] : memref<2x256xf32, #tpu.memory_space<vmem>>, vector<2x32xf32>
    tpu.vector_store %arg6[%c0_27, %c96], %137 {strides = array<i32>} : memref<2x256xf32, #tpu.memory_space<vmem>>, vector<2x32xf32>,
    %139 = vector.extract_strided_slice %6 {offsets = [0, 4, 0], sizes = [2, 1, 128], strides = [1, 1, 1]} : vector<2x8x128xf32> to vector<2x1x128xf32>
    %140 = vector.shape_cast %139 : vector<2x1x128xf32> to vector<2x128xf32>
    %cst_28 = arith.constant dense<0.000000e+00> : vector<2x128xf32>
    %141 = tpu.matmul %133, %7, %cst_28 {dimension_numbers = #tpu.dot_dimension_numbers<[1], [0], [0], [1], [0, 0, 1, 1], [], []>} : vector<2x32xf32>, vector<32x128xf32>, vector<2x128xf32> -> vector<2x128xf32>
    %142 = arith.addf %140, %141 : vector<2x128xf32>
    %143 = arith.negf %142 : vector<2x128xf32>
    %144 = math.exp %143 : vector<2x128xf32>
    %cst_29 = arith.constant 1.000000e+00 : f32
    %145 = vector.broadcast %cst_29 : f32 to vector<2x128xf32>
    %146 = arith.addf %145, %144 : vector<2x128xf32>
    %147 = arith.divf %145, %146 : vector<2x128xf32>
    %148 = math.tanh %142 : vector<2x128xf32>
    %149 = vector.extract_strided_slice %147 {offsets = [0, 0], sizes = [2, 32], strides = [1, 1]} : vector<2x128xf32> to vector<2x32xf32>
    %150 = vector.extract_strided_slice %147 {offsets = [0, 32], sizes = [2, 32], strides = [1, 1]} : vector<2x128xf32> to vector<2x32xf32>
    %151 = vector.extract_strided_slice %148 {offsets = [0, 64], sizes = [2, 32], strides = [1, 1]} : vector<2x128xf32> to vector<2x32xf32>
    %152 = vector.extract_strided_slice %147 {offsets = [0, 96], sizes = [2, 32], strides = [1, 1]} : vector<2x128xf32> to vector<2x32xf32>
    %153 = arith.mulf %150, %130 : vector<2x32xf32>
    %154 = arith.mulf %149, %151 : vector<2x32xf32>
    %155 = arith.addf %153, %154 : vector<2x32xf32>
    %156 = math.tanh %155 : vector<2x32xf32>
    %157 = arith.mulf %152, %156 : vector<2x32xf32>
    %c4_i32 = arith.constant 4 : i32
    %158 = vector.broadcast %c4_i32 : i32 to vector<2x1xi32>
    %159 = arith.cmpi sgt, %8, %158 : vector<2x1xi32>
    %160 = vector.shape_cast %159 : vector<2x1xi1> to vector<2x1xi1>
    %161 = vector.broadcast %160 : vector<2x1xi1> to vector<2x32xi1>
    %162 = arith.select %161, %155, %130 : vector<2x32xi1>, vector<2x32xf32>
    %163 = vector.shape_cast %159 : vector<2x1xi1> to vector<2x1xi1>
    %164 = vector.broadcast %163 : vector<2x1xi1> to vector<2x32xi1>
    %165 = arith.select %164, %157, %133 : vector<2x32xi1>, vector<2x32xf32>
    %cst_30 = arith.constant 0.000000e+00 : f32
    %166 = vector.shape_cast %159 : vector<2x1xi1> to vector<2x1xi1>
    %167 = vector.broadcast %166 : vector<2x1xi1> to vector<2x32xi1>
    %168 = vector.broadcast %cst_30 : f32 to vector<2x32xf32>
    %169 = arith.select %167, %157, %168 : vector<2x32xi1>, vector<2x32xf32>
    %c0_31 = arith.constant 0 : index
    %c128 = arith.constant 128 : index
    %170 = vector.load %arg6[%c0_31, %c128] : memref<2x256xf32, #tpu.memory_space<vmem>>, vector<2x32xf32>
    tpu.vector_store %arg6[%c0_31, %c128], %169 {strides = array<i32>} : memref<2x256xf32, #tpu.memory_space<vmem>>, vector<2x32xf32>,
    %171 = vector.extract_strided_slice %6 {offsets = [0, 5, 0], sizes = [2, 1, 128], strides = [1, 1, 1]} : vector<2x8x128xf32> to vector<2x1x128xf32>
    %172 = vector.shape_cast %171 : vector<2x1x128xf32> to vector<2x128xf32>
    %cst_32 = arith.constant dense<0.000000e+00> : vector<2x128xf32>
    %173 = tpu.matmul %165, %7, %cst_32 {dimension_numbers = #tpu.dot_dimension_numbers<[1], [0], [0], [1], [0, 0, 1, 1], [], []>} : vector<2x32xf32>, vector<32x128xf32>, vector<2x128xf32> -> vector<2x128xf32>
    %174 = arith.addf %172, %173 : vector<2x128xf32>
    %175 = arith.negf %174 : vector<2x128xf32>
    %176 = math.exp %175 : vector<2x128xf32>
    %cst_33 = arith.constant 1.000000e+00 : f32
    %177 = vector.broadcast %cst_33 : f32 to vector<2x128xf32>
    %178 = arith.addf %177, %176 : vector<2x128xf32>
    %179 = arith.divf %177, %178 : vector<2x128xf32>
    %180 = math.tanh %174 : vector<2x128xf32>
    %181 = vector.extract_strided_slice %179 {offsets = [0, 0], sizes = [2, 32], strides = [1, 1]} : vector<2x128xf32> to vector<2x32xf32>
    %182 = vector.extract_strided_slice %179 {offsets = [0, 32], sizes = [2, 32], strides = [1, 1]} : vector<2x128xf32> to vector<2x32xf32>
    %183 = vector.extract_strided_slice %180 {offsets = [0, 64], sizes = [2, 32], strides = [1, 1]} : vector<2x128xf32> to vector<2x32xf32>
    %184 = vector.extract_strided_slice %179 {offsets = [0, 96], sizes = [2, 32], strides = [1, 1]} : vector<2x128xf32> to vector<2x32xf32>
    %185 = arith.mulf %182, %162 : vector<2x32xf32>
    %186 = arith.mulf %181, %183 : vector<2x32xf32>
    %187 = arith.addf %185, %186 : vector<2x32xf32>
    %188 = math.tanh %187 : vector<2x32xf32>
    %189 = arith.mulf %184, %188 : vector<2x32xf32>
    %c5_i32 = arith.constant 5 : i32
    %190 = vector.broadcast %c5_i32 : i32 to vector<2x1xi32>
    %191 = arith.cmpi sgt, %8, %190 : vector<2x1xi32>
    %192 = vector.shape_cast %191 : vector<2x1xi1> to vector<2x1xi1>
    %193 = vector.broadcast %192 : vector<2x1xi1> to vector<2x32xi1>
    %194 = arith.select %193, %187, %162 : vector<2x32xi1>, vector<2x32xf32>
    %195 = vector.shape_cast %191 : vector<2x1xi1> to vector<2x1xi1>
    %196 = vector.broadcast %195 : vector<2x1xi1> to vector<2x32xi1>
    %197 = arith.select %196, %189, %165 : vector<2x32xi1>, vector<2x32xf32>
    %cst_34 = arith.constant 0.000000e+00 : f32
    %198 = vector.shape_cast %191 : vector<2x1xi1> to vector<2x1xi1>
    %199 = vector.broadcast %198 : vector<2x1xi1> to vector<2x32xi1>
    %200 = vector.broadcast %cst_34 : f32 to vector<2x32xf32>
    %201 = arith.select %199, %189, %200 : vector<2x32xi1>, vector<2x32xf32>
    %c0_35 = arith.constant 0 : index
    %c160 = arith.constant 160 : index
    %202 = vector.load %arg6[%c0_35, %c160] : memref<2x256xf32, #tpu.memory_space<vmem>>, vector<2x32xf32>
    tpu.vector_store %arg6[%c0_35, %c160], %201 {strides = array<i32>} : memref<2x256xf32, #tpu.memory_space<vmem>>, vector<2x32xf32>,
    %203 = vector.extract_strided_slice %6 {offsets = [0, 6, 0], sizes = [2, 1, 128], strides = [1, 1, 1]} : vector<2x8x128xf32> to vector<2x1x128xf32>
    %204 = vector.shape_cast %203 : vector<2x1x128xf32> to vector<2x128xf32>
    %cst_36 = arith.constant dense<0.000000e+00> : vector<2x128xf32>
    %205 = tpu.matmul %197, %7, %cst_36 {dimension_numbers = #tpu.dot_dimension_numbers<[1], [0], [0], [1], [0, 0, 1, 1], [], []>} : vector<2x32xf32>, vector<32x128xf32>, vector<2x128xf32> -> vector<2x128xf32>
    %206 = arith.addf %204, %205 : vector<2x128xf32>
    %207 = arith.negf %206 : vector<2x128xf32>
    %208 = math.exp %207 : vector<2x128xf32>
    %cst_37 = arith.constant 1.000000e+00 : f32
    %209 = vector.broadcast %cst_37 : f32 to vector<2x128xf32>
    %210 = arith.addf %209, %208 : vector<2x128xf32>
    %211 = arith.divf %209, %210 : vector<2x128xf32>
    %212 = math.tanh %206 : vector<2x128xf32>
    %213 = vector.extract_strided_slice %211 {offsets = [0, 0], sizes = [2, 32], strides = [1, 1]} : vector<2x128xf32> to vector<2x32xf32>
    %214 = vector.extract_strided_slice %211 {offsets = [0, 32], sizes = [2, 32], strides = [1, 1]} : vector<2x128xf32> to vector<2x32xf32>
    %215 = vector.extract_strided_slice %212 {offsets = [0, 64], sizes = [2, 32], strides = [1, 1]} : vector<2x128xf32> to vector<2x32xf32>
    %216 = vector.extract_strided_slice %211 {offsets = [0, 96], sizes = [2, 32], strides = [1, 1]} : vector<2x128xf32> to vector<2x32xf32>
    %217 = arith.mulf %214, %194 : vector<2x32xf32>
    %218 = arith.mulf %213, %215 : vector<2x32xf32>
    %219 = arith.addf %217, %218 : vector<2x32xf32>
    %220 = math.tanh %219 : vector<2x32xf32>
    %221 = arith.mulf %216, %220 : vector<2x32xf32>
    %c6_i32 = arith.constant 6 : i32
    %222 = vector.broadcast %c6_i32 : i32 to vector<2x1xi32>
    %223 = arith.cmpi sgt, %8, %222 : vector<2x1xi32>
    %224 = vector.shape_cast %223 : vector<2x1xi1> to vector<2x1xi1>
    %225 = vector.broadcast %224 : vector<2x1xi1> to vector<2x32xi1>
    %226 = arith.select %225, %219, %194 : vector<2x32xi1>, vector<2x32xf32>
    %227 = vector.shape_cast %223 : vector<2x1xi1> to vector<2x1xi1>
    %228 = vector.broadcast %227 : vector<2x1xi1> to vector<2x32xi1>
    %229 = arith.select %228, %221, %197 : vector<2x32xi1>, vector<2x32xf32>
    %cst_38 = arith.constant 0.000000e+00 : f32
    %230 = vector.shape_cast %223 : vector<2x1xi1> to vector<2x1xi1>
    %231 = vector.broadcast %230 : vector<2x1xi1> to vector<2x32xi1>
    %232 = vector.broadcast %cst_38 : f32 to vector<2x32xf32>
    %233 = arith.select %231, %221, %232 : vector<2x32xi1>, vector<2x32xf32>
    %c0_39 = arith.constant 0 : index
    %c192 = arith.constant 192 : index
    %234 = vector.load %arg6[%c0_39, %c192] : memref<2x256xf32, #tpu.memory_space<vmem>>, vector<2x32xf32>
    tpu.vector_store %arg6[%c0_39, %c192], %233 {strides = array<i32>} : memref<2x256xf32, #tpu.memory_space<vmem>>, vector<2x32xf32>,
    %235 = vector.extract_strided_slice %6 {offsets = [0, 7, 0], sizes = [2, 1, 128], strides = [1, 1, 1]} : vector<2x8x128xf32> to vector<2x1x128xf32>
    %236 = vector.shape_cast %235 : vector<2x1x128xf32> to vector<2x128xf32>
    %cst_40 = arith.constant dense<0.000000e+00> : vector<2x128xf32>
    %237 = tpu.matmul %229, %7, %cst_40 {dimension_numbers = #tpu.dot_dimension_numbers<[1], [0], [0], [1], [0, 0, 1, 1], [], []>} : vector<2x32xf32>, vector<32x128xf32>, vector<2x128xf32> -> vector<2x128xf32>
    %238 = arith.addf %236, %237 : vector<2x128xf32>
    %239 = arith.negf %238 : vector<2x128xf32>
    %240 = math.exp %239 : vector<2x128xf32>
    %cst_41 = arith.constant 1.000000e+00 : f32
    %241 = vector.broadcast %cst_41 : f32 to vector<2x128xf32>
    %242 = arith.addf %241, %240 : vector<2x128xf32>
    %243 = arith.divf %241, %242 : vector<2x128xf32>
    %244 = math.tanh %238 : vector<2x128xf32>
    %245 = vector.extract_strided_slice %243 {offsets = [0, 0], sizes = [2, 32], strides = [1, 1]} : vector<2x128xf32> to vector<2x32xf32>
    %246 = vector.extract_strided_slice %243 {offsets = [0, 32], sizes = [2, 32], strides = [1, 1]} : vector<2x128xf32> to vector<2x32xf32>
    %247 = vector.extract_strided_slice %244 {offsets = [0, 64], sizes = [2, 32], strides = [1, 1]} : vector<2x128xf32> to vector<2x32xf32>
    %248 = vector.extract_strided_slice %243 {offsets = [0, 96], sizes = [2, 32], strides = [1, 1]} : vector<2x128xf32> to vector<2x32xf32>
    %249 = arith.mulf %246, %226 : vector<2x32xf32>
    %250 = arith.mulf %245, %247 : vector<2x32xf32>
    %251 = arith.addf %249, %250 : vector<2x32xf32>
    %252 = math.tanh %251 : vector<2x32xf32>
    %253 = arith.mulf %248, %252 : vector<2x32xf32>
    %c7_i32 = arith.constant 7 : i32
    %254 = vector.broadcast %c7_i32 : i32 to vector<2x1xi32>
    %255 = arith.cmpi sgt, %8, %254 : vector<2x1xi32>
    %cst_42 = arith.constant 0.000000e+00 : f32
    %256 = vector.shape_cast %255 : vector<2x1xi1> to vector<2x1xi1>
    %257 = vector.broadcast %256 : vector<2x1xi1> to vector<2x32xi1>
    %258 = vector.broadcast %cst_42 : f32 to vector<2x32xf32>
    %259 = arith.select %257, %253, %258 : vector<2x32xi1>, vector<2x32xf32>
    %c0_43 = arith.constant 0 : index
    %c224 = arith.constant 224 : index
    %260 = vector.load %arg6[%c0_43, %c224] : memref<2x256xf32, #tpu.memory_space<vmem>>, vector<2x32xf32>
    tpu.vector_store %arg6[%c0_43, %c224], %259 {strides = array<i32>} : memref<2x256xf32, #tpu.memory_space<vmem>>, vector<2x32xf32>,
    return
  }
  func.func @transform_0(%arg0: i32) -> (i32, i32) {
    %c0_i32 = arith.constant 0 : i32
    %c0_i32_0 = arith.constant 0 : i32
    %c0_i32_1 = arith.constant 0 : i32
    return %c0_i32, %c0_i32_0 : i32, i32
  }
  func.func @transform_1(%arg0: i32) -> (i32, i32) {
    %c0_i32 = arith.constant 0 : i32
    %c0_i32_0 = arith.constant 0 : i32
    %c0_i32_1 = arith.constant 0 : i32
    return %c0_i32, %c0_i32_0 : i32, i32
  }
  func.func @transform_2(%arg0: i32) -> (i32, i32) {
    %c0_i32 = arith.constant 0 : i32
    %c0_i32_0 = arith.constant 0 : i32
    %c0_i32_1 = arith.constant 0 : i32
    return %c0_i32, %c0_i32_0 : i32, i32
  }
  func.func @transform_3(%arg0: i32) -> (i32, i32) {
    %c0_i32 = arith.constant 0 : i32
    %c0_i32_0 = arith.constant 0 : i32
    %c0_i32_1 = arith.constant 0 : i32
    return %c0_i32, %c0_i32_0 : i32, i32
  }
  func.func @transform_4(%arg0: i32) -> (i32, i32) {
    %c0_i32 = arith.constant 0 : i32
    %c0_i32_0 = arith.constant 0 : i32
    %c0_i32_1 = arith.constant 0 : i32
    return %c0_i32, %c0_i32_0 : i32, i32
  }
  func.func @transform_5(%arg0: i32) -> (i32, i32) {
    %c0_i32 = arith.constant 0 : i32
    %c0_i32_0 = arith.constant 0 : i32
    %c0_i32_1 = arith.constant 0 : i32
    return %c0_i32, %c0_i32_0 : i32, i32
  }
}

</mosaic_0001>

<bundles_post_ra>
// kernel: tpu_custom_call.1
= control target key start
LH: loop header
LB: loop body
LE: loop exit
PB: predicated region body
PF: predicated region fallthrough
CT: control target
= control target key end

     0   :  { %10 = vsyncpa [#allocation3], 0  ;;  %s1851_s0 = inlined_call_operand.hbm [shape: f32[16,16], index: 0, kind: input, shape index: {}]   ;;  %s1852_s1 = inlined_call_operand.hbm [shape: f32[16,128], index: 1, kind: input, shape index: {}]   ;;  %s1853_s2 = inlined_call_operand.hbm [shape: f32[32,128], index: 2, kind: input, shape index: {}]   ;;  %s1854_s3 = inlined_call_operand.vmem [shape: f32[1,128], index: 3, kind: input, shape index: {}]   ;;  %s1855_s4 = inlined_call_operand.vmem [shape: s32[2,1], index: 4, kind: input, shape index: {}]   ;;  %s1856_s5 = inlined_call_operand.hbm [shape: f32[2,256], index: 5, kind: output, shape index: {}]  }
   0x1   :  { %11 = vsyncpa [#allocation6], 0 }
   0x2   :  { %12 = vsyncpa [#allocation4], 0  ;;  %s30_s20 = sshll.u32 %s1852_s1, 4  ;;  %s1515_s21 = smov [#allocation5]   ;;  %s31_s20 = int_to_ptr.hbm [resolvable:$true] %s30_s20 }
   0x3   :  { %s32_s22 = sshll.u32 %s1515_s21, 4  ;;  %s17_s25 = sshll.u32 %s1851_s0, 4  ;;  %s33_s22 = int_to_ptr.vmem [resolvable:$true] %s32_s22  ;;  %s18_s25 = int_to_ptr.hbm [resolvable:$true] %s17_s25 }
   0x4   :  { %s1516_s26 = smov 128   ;;  %s1517_s27 = smov 8  }
   0x5   :  { %38 = dma.hbm_to_vmem [thread:$0]  %s31_s20, 256, %s33_s22, [#allocation6], %s1516_s26, %s1516_s26, %s1517_s27  }
   0x6   :  { %s1518_s28 = smov [#allocation2]   ;;  %s43_s7 = sshll.u32 %s1853_s2, 4  ;;  %s44_s7 = int_to_ptr.hbm [resolvable:$true] %s43_s7 }
   0x7   :  { %s19_s29 = sshll.u32 %s1518_s28, 4  ;;  %s1519_s1 = smov [#allocation7]   ;;  %s20_s29 = int_to_ptr.vmem [resolvable:$true] %s19_s29 }
   0x8   :  { %25 = dma.hbm_to_vmem [thread:$0]  %s18_s25, 256, %s20_s29, [#allocation3], %s1516_s26, %s1516_s26, %s1517_s27  }
   0x9   :  { %s45_s8 = sshll.u32 %s1519_s1, 4  ;;  %s46_s8 = int_to_ptr.vmem [resolvable:$true] %s45_s8 }
   0xa   :  { %51 = dma.hbm_to_vmem [thread:$0]  %s44_s7, 512, %s46_s8, [#allocation6], %s1516_s26, %s1516_s26, %s1517_s27  }
   0xb   :  { %1509 = dma.done.wait [#allocation3], 256  }
   0xc   :  { %1510 = vsyncadd [#allocation3], 4294967040 }
   0xd   :  { %1511 = dma.done.wait [#allocation6], 768  }
   0xe   :  { %1512 = vsyncadd [#allocation6], 4294966528  ;;  %v71_v0 = vld [vmem:[#allocation5 + $0x8] sm:$0xff]  ;;  %v70_v2 = vld [vmem:[#allocation5] sm:$0xff]  ;;  %vm76_vm0 = vcmask 130048   ;;  %v1520_v7 = vmov 0.0  }
   0xf   :  { %v109_v1 = vld [vmem:[#allocation7 + $0x18] sm:$0xff]  ;;  %97 = vmatpush.msra.mxu0 %v71_v0  ;;  %v108_v3 = vld [vmem:[#allocation7 + $0x10] sm:$0xff]  ;;  %v68_v4 = vld [vmem:[#allocation2] sm:$0xff]  ;;  %s1521_s9 = smov 64   ;;  %v1522_v27 = vmov 0   ;;  %vm224_vm10 = vcmask 1041409  }
  0x10   :  { %127 = vmatpush.msra.mxu1 %v109_v1  ;;  %v107_v5 = vld [vmem:[#allocation7 + $0x8] sm:$0xff]  ;;  %255 = vmatpush.msra.mxu2 %v109_v1  ;;  %v106_v6 = vld [vmem:[#allocation7] sm:$0xff]  ;;  %s1524_s12 = smov 96   ;;  %vm238_vm12 = vcmask 254976   ;;  %vm111_vm13 = vcmask 261120   ;;  %s1233_s18 = sshll.u32 %s1856_s5, 4  ;;  %s1234_s18 = int_to_ptr.hbm [resolvable:$true] %s1233_s18 }
  0x11   :  { %395 = vmatpush.msra.mxu3 %v109_v1  ;;  %98 = vmatpush.msra.mxu0 %v70_v2  ;;  %v69_v8 = vld [vmem:[#allocation2 + $0x8] sm:$0xff]  ;;  %v1283_v11 = vld [vmem:[%s1854_s3] ss:$0 sm:$0xff]  ;;  %s1523_s3 = smov 32  }
  0x12   :  { %128 = vmatpush.msra.mxu1 %v108_v3  ;;  %1244 = vmatmul.msk.f32.vlgmr.msra.gmra.mxu0 %vm76_vm0, %v68_v4  ;;  %v1586_v51 = vld [vmem:[%s1855_s4] sm:$0x3] }
  0x13   :  { %256 = vmatpush.msra.mxu2 %v108_v3  ;;  %396 = vmatpush.msra.mxu3 %v108_v3  ;;  %vm215_vm9 = vcmp.gt.s32.totalorder %v1586_v51, 0 }
  0x14   :  { %129 = vmatpush.msra.mxu1 %v107_v5  ;;  %965 = vmatpush.msrb.mxu0 %v109_v1  ;;  %v216_v52 = vsel %vm215_vm9, 1, %v1522_v27 }
  0x15   :  { %257 = vmatpush.msra.mxu2 %v107_v5  ;;  %397 = vmatpush.msra.mxu3 %v107_v5 }
  0x16   :  { %130 = vmatpush.msra.mxu1 %v106_v6  ;;  %966 = vmatpush.msrb.mxu0 %v108_v3 }
  0x17   :  { %131 = vmatmul.f32.vlgmr.msra.gmra.mxu1 %v1520_v7  ;;  %258 = vmatpush.msra.mxu2 %v106_v6 }
  0x18   :  { %398 = vmatpush.msra.mxu3 %v106_v6  ;;  %539 = vmatpush.msrb.mxu1 %v109_v1 }
  0x19   :  { %683 = vmatpush.msrb.mxu2 %v109_v1  ;;  %967 = vmatpush.msrb.mxu0 %v107_v5 }
  0x1a   :  { %822 = vmatpush.msrb.mxu3 %v109_v1  ;;  %540 = vmatpush.msrb.mxu1 %v108_v3 }
  0x1b   :  { %1245 = vmatmul.msk.f32.gmra.mxu0 %vm76_vm0, %v69_v8  ;;  %684 = vmatpush.msrb.mxu2 %v108_v3 }
  0x1c   :  { %541 = vmatpush.msrb.mxu1 %v107_v5  ;;  %823 = vmatpush.msrb.mxu3 %v108_v3 }
  0x1d   :  { %685 = vmatpush.msrb.mxu2 %v107_v5  ;;  %968 = vmatpush.msrb.mxu0 %v106_v6 }
  0x1e   :  { %542 = vmatpush.msrb.mxu1 %v106_v6  ;;  %824 = vmatpush.msrb.mxu3 %v107_v5 }
  0x1f   :  { %686 = vmatpush.msrb.mxu2 %v106_v6  ;;  %1280 = vset.pattern.permute.xlu0 %v1522_v27 }
  0x20   :  { %825 = vmatpush.msrb.mxu3 %v106_v6  ;;  %1108 = vmatpush.msra.mxu1 %v109_v1 }
  0x21   :  { %1281 = vset.pattern.permute.xlu2 %v1522_v27  ;;  %1282 = vset.pattern.permute.xlu1 %v1522_v27 }
  0x22   :  { %1109 = vmatpush.msra.mxu1 %v108_v3 }
  0x24   :  { %1110 = vmatpush.msra.mxu1 %v107_v5 }
  0x26   :  { %1111 = vmatpush.msra.mxu1 %v106_v6 }
  0x8f   :  { %v100_v9 = vpop.f32.mrf.mxu0 }
  0x90   :  { %v1573_v16 = vadd.f32 %v1283_v11, %v100_v9 }
  0x94   :  { %v132_v10 = vpop.f32.mrf.mxu1 }
  0x95   :  { %v136_v12 = vrot.slane %v132_v10, 1  ;;  %v139_v17 = vadd.f32 %v132_v10, %v1573_v16 }
  0x97   :  { %v1246_v21 = vmul.f32 -1.442695, %v139_v17 }
  0x98   :  { %v103_v13 = vpop.f32.mrf.mxu0 }
  0x99   :  { %v1570_v14 = vadd.f32 %v1283_v11, %v103_v13 }
  0x9b   :  { %v140_v15 = vadd.f32 %v136_v12, %v1570_v14 }
  0x9d   :  { %1284 = vtanh.f32 %v140_v15  ;;  %v1247_v20 = vmul.f32 -1.442695, %v140_v15 }
  0x9e   :  { %1286 = vtanh.f32 %v139_v17 }
  0x9f   :  { %1288 = vpow2.f32 %v1247_v20 }
  0xa0   :  { %1290 = vpow2.f32 %v1246_v21 }
  0xa3   :  { %v1285_v18 = vpop.eup %1284 }
  0xa4   :  { %187 = vrot.lane.b32.xlu0 %v1285_v18, %s1521_s9  ;;  %v1287_v19 = vpop.eup %1286 }
  0xa5   :  { %v1289_v22 = vpop.eup %1288 }
  0xa6   :  { %v148_v23 = vadd.f32 1.0, %v1289_v22  ;;  %v1291_v24 = vpop.eup %1290 }
  0xa7   :  { %v147_v25 = vadd.f32 1.0, %v1291_v24 }
  0xa8   :  { %1292 = vrcp.f32 %v148_v23  ;;  %v175_v35 = vand.u32 2147483648, %v148_v23  ;;  %vm169_vm2 = vweird.f32 %v148_v23  ;;  %v173_v36 = vand.u32 2147483647, %v148_v23 }
  0xa9   :  { %1294 = vrcp.f32 %v147_v25  ;;  %v160_v44 = vand.u32 2147483648, %v147_v25  ;;  %vm154_vm6 = vweird.f32 %v147_v25  ;;  %v158_v45 = vand.u32 2147483647, %v147_v25 }
  0xaa   :  { %v176_v39 = vor.u32 1.1754944e-38, %v175_v35  ;;  %vm174_vm4 = vcmp.eq.f32.partialorder %v173_v36, 8.507059e+37 }
  0xab   :  { %v161_v47 = vor.u32 1.1754944e-38, %v160_v44  ;;  %vm159_vm8 = vcmp.eq.f32.partialorder %v158_v45, 8.507059e+37 }
  0xac   :  { %185 = vrot.lane.b32.xlu0 %v1287_v19, %s1521_s9 }
  0xae   :  { %v1293_v26 = vpop.eup %1292 }
  0xaf   :  { %v165_v28 = vmul.f32 %v1293_v26, %v148_v23  ;;  %v1295_v30 = vpop.eup %1294  ;;  %vm170_vm1 = vweird.f32 %v1293_v26 }
  0xb0   :  { %v150_v32 = vmul.f32 %v1295_v30, %v147_v25  ;;  %vm171_vm3 = vmor %vm169_vm2, %vm170_vm1  ;;  %vm155_vm5 = vweird.f32 %v1295_v30  ;;  %vm351_vm2 = vcmp.gt.s32.totalorder %v1586_v51, 1 }
  0xb1   :  { %v166_v29 = vsub.f32 1.0, %v165_v28  ;;  %vm156_vm7 = vmor %vm154_vm6, %vm155_vm5 }
  0xb2   :  { %v151_v34 = vsub.f32 1.0, %v150_v32 }
  0xb3   :  { %v167_v31 = vmul.f32 %v1293_v26, %v166_v29 }
  0xb4   :  { %v152_v38 = vmul.f32 %v1295_v30, %v151_v34  ;;  %218 = vperm.xlu0 %1280, %v216_v52  }
  0xb5   :  { %v168_v33 = vadd.f32 %v1293_v26, %v167_v31 }
  0xb6   :  { %v153_v43 = vadd.f32 %v1295_v30, %v152_v38 }
  0xb7   :  { %v172_v37 = vsel %vm171_vm3, %v1293_v26, %v168_v33 }
  0xb8   :  { %v177_v41 = vsel %vm174_vm4, %v176_v39, %v172_v37  ;;  %v157_v46 = vsel %vm156_vm7, %v1295_v30, %v153_v43  ;;  %v352_v39 = vsel %vm351_vm2, 1, %v1522_v27 }
  0xb9   :  { %v162_v49 = vsel %vm159_vm8, %v161_v47, %v157_v46  ;;  %v182_v53 = vmul.f32 0.0, %v177_v41 }
  0xba   :  { %v181_v56 = vmul.f32 0.0, %v162_v49 }
 0x116   :  { %v188_v40 = vpop.permute.xlu0 %187 }
 0x117   :  { %v192_v42 = vmul.f32 %v188_v40, %v177_v41 }
 0x119   :  { %197 = vrot.lane.b32.xlu1 %v192_v42, %s1523_s3 }
 0x11e   :  { %v186_v48 = vpop.permute.xlu0 %185 }
 0x11f   :  { %v191_v50 = vmul.f32 %v186_v48, %v162_v49 }
 0x121   :  { %195 = vrot.lane.b32.xlu1 %v191_v50, %s1523_s3 }
 0x126   :  { %v219_v5 = vpop.permute.xlu0 %218 }
 0x127   :  { %vm220_vm11 = vcmp.eq.s32.totalorder %v219_v5, 1 }
 0x18b   :  { %v198_v54 = vpop.permute.xlu1 %197 }
 0x18c   :  { %v202_v55 = vadd.f32 %v198_v54, %v182_v53 }
 0x18e   :  { %1296 = vtanh.f32 %v202_v55  ;;  %v223_v61 = vrot.slane %v202_v55, 7 }
 0x193   :  { %v196_v57 = vpop.permute.xlu1 %195 }
 0x194   :  { %v1297_v58 = vpop.eup %1296  ;;  %v201_v59 = vadd.f32 %v196_v57, %v181_v56 }
 0x195   :  { %209 = vrot.lane.b32.xlu2 %v1297_v58, %s1521_s9 }
 0x196   :  { %1298 = vtanh.f32 %v201_v59  ;;  %v225_v62 = vsel %vm224_vm10, %v223_v61, %v201_v59 }
 0x19c   :  { %v1299_v60 = vpop.eup %1298 }
 0x19d   :  { %207 = vrot.lane.b32.xlu2 %v1299_v60, %s1521_s9 }
 0x1a5   :  { %226 = vrot.lane.b32.xlu2 %v225_v62, %s1524_s12 }
 0x1ef   :  { %v210_v63 = vpop.permute.xlu2 %209 }
 0x1f0   :  { %v214_v0 = vmul.f32 %v210_v63, %v177_v41 }
 0x1f2   :  { %v232_v2 = vrot.slane %v214_v0, 7 }
 0x1f7   :  { %v208_v1 = vpop.permute.xlu2 %207 }
 0x1f8   :  { %v213_v3 = vmul.f32 %v208_v1, %v162_v49 }
 0x1fa   :  { %v233_v4 = vsel %vm224_vm10, %v232_v2, %v213_v3 }
 0x1fb   :  { %234 = vrot.lane.b32.xlu1 %v233_v4, %s1523_s3 }
 0x1ff   :  { %v227_v6 = vpop.permute.xlu2 %226 }
 0x200   :  { %v1596_v7 = vsel %vm220_vm11, %v227_v6, 0.0 }
 0x201   :  { %v310_v8 = vrot.slane %v1596_v7, 7 }
 0x203   :  { %311 = vrot.lane.b32.xlu0 %v310_v8, %s1523_s3 }
 0x26d   :  { %v235_v9 = vpop.permute.xlu1 %234 }
 0x26e   :  { %v1600_v10 = vsel %vm220_vm11, %v235_v9, 0.0 }
 0x26f   :  { %239 = vst.msk [vmem:[#allocation8] sm:$0x3] %vm238_vm12, %v1600_v10  ;;  %1248 = vmatmul.msk.f32.vlgmr.msra.gmra.mxu2 %vm111_vm13, %v1600_v10 }
 0x275   :  { %v312_v52 = vpop.permute.xlu0 %311 }
 0x2f2   :  { %v260_v11 = vpop.f32.mrf.mxu2 }
 0x2f3   :  { %v264_v12 = vrot.slane %v260_v11, 7  ;;  %v268_v13 = vadd.f32 %v260_v11, %v1570_v14 }
 0x2f5   :  { %v267_v15 = vadd.f32 %v264_v12, %v1573_v16  ;;  %1300 = vtanh.f32 %v268_v13  ;;  %v1250_v19 = vmul.f32 -1.442695, %v268_v13 }
 0x2f7   :  { %1302 = vtanh.f32 %v267_v15  ;;  %v1249_v24 = vmul.f32 -1.442695, %v267_v15 }
 0x2f8   :  { %1304 = vpow2.f32 %v1250_v19 }
 0x2fb   :  { %v1301_v17 = vpop.eup %1300 }
 0x2fc   :  { %323 = vrot.lane.b32.xlu2 %v1301_v17, %s1521_s9 }
 0x2fd   :  { %v1303_v18 = vpop.eup %1302 }
 0x2fe   :  { %321 = vrot.lane.b32.xlu1 %v1303_v18, %s1521_s9  ;;  %v1305_v20 = vpop.eup %1304 }
 0x2ff   :  { %v276_v21 = vadd.f32 1.0, %v1305_v20 }
 0x301   :  { %1306 = vrcp.f32 %v276_v21  ;;  %v303_v30 = vand.u32 2147483648, %v276_v21  ;;  %vm297_vm15 = vweird.f32 %v276_v21  ;;  %v301_v32 = vand.u32 2147483647, %v276_v21 }
 0x302   :  { %1308 = vpow2.f32 %v1249_v24 }
 0x303   :  { %v304_v34 = vor.u32 1.1754944e-38, %v303_v30  ;;  %vm302_vm1 = vcmp.eq.f32.partialorder %v301_v32, 8.507059e+37 }
 0x306   :  { %313 = vrot.lane.b32.xlu1 %v1596_v7, %s1523_s3 }
 0x307   :  { %v1307_v22 = vpop.eup %1306 }
 0x308   :  { %v293_v23 = vmul.f32 %v1307_v22, %v276_v21  ;;  %v1309_v28 = vpop.eup %1308  ;;  %vm298_vm14 = vweird.f32 %v1307_v22 }
 0x309   :  { %v275_v31 = vadd.f32 1.0, %v1309_v28  ;;  %vm299_vm0 = vmor %vm297_vm15, %vm298_vm14 }
 0x30a   :  { %v294_v25 = vsub.f32 1.0, %v293_v23 }
 0x30b   :  { %1310 = vrcp.f32 %v275_v31  ;;  %v288_v44 = vand.u32 2147483648, %v275_v31  ;;  %vm282_vm4 = vweird.f32 %v275_v31  ;;  %v286_v45 = vand.u32 2147483647, %v275_v31 }
 0x30c   :  { %v295_v26 = vmul.f32 %v1307_v22, %v294_v25 }
 0x30d   :  { %v289_v47 = vor.u32 1.1754944e-38, %v288_v44  ;;  %vm287_vm6 = vcmp.eq.f32.partialorder %v286_v45, 8.507059e+37 }
 0x30e   :  { %v296_v29 = vadd.f32 %v1307_v22, %v295_v26 }
 0x310   :  { %v300_v33 = vsel %vm299_vm0, %v1307_v22, %v296_v29 }
 0x311   :  { %v305_v35 = vsel %vm302_vm1, %v304_v34, %v300_v33  ;;  %v1311_v38 = vpop.eup %1310 }
 0x312   :  { %v278_v40 = vmul.f32 %v1311_v38, %v275_v31  ;;  %vm283_vm3 = vweird.f32 %v1311_v38 }
 0x313   :  { %vm284_vm5 = vmor %vm282_vm4, %vm283_vm3  ;;  %vm493_vm3 = vcmp.gt.s32.totalorder %v1586_v51, 2 }
 0x314   :  { %v279_v41 = vsub.f32 1.0, %v278_v40 }
 0x316   :  { %v280_v42 = vmul.f32 %v1311_v38, %v279_v41 }
 0x318   :  { %v281_v43 = vadd.f32 %v1311_v38, %v280_v42 }
 0x31a   :  { %v285_v46 = vsel %vm284_vm5, %v1311_v38, %v281_v43 }
 0x31b   :  { %v290_v49 = vsel %vm287_vm6, %v289_v47, %v285_v46 }
 0x31c   :  { %v317_v57 = vmul.f32 %v312_v52, %v290_v49 }
 0x356   :  { %v324_v36 = vpop.permute.xlu2 %323 }
 0x357   :  { %v328_v37 = vmul.f32 %v324_v36, %v305_v35 }
 0x359   :  { %333 = vrot.lane.b32.xlu0 %v328_v37, %s1523_s3 }
 0x361   :  { %354 = vperm.xlu0 %1280, %v352_v39  }
 0x370   :  { %v322_v48 = vpop.permute.xlu1 %321 }
 0x371   :  { %v327_v50 = vmul.f32 %v322_v48, %v290_v49 }
 0x373   :  { %331 = vrot.lane.b32.xlu2 %v327_v50, %s1523_s3 }
 0x378   :  { %v314_v53 = vpop.permute.xlu1 %313 }
 0x379   :  { %v318_v54 = vmul.f32 %v314_v53, %v305_v35 }
 0x3cb   :  { %v334_v55 = vpop.permute.xlu0 %333 }
 0x3cc   :  { %v338_v56 = vadd.f32 %v334_v55, %v318_v54 }
 0x3cd   :  { %v332_v58 = vpop.permute.xlu2 %331 }
 0x3ce   :  { %1312 = vtanh.f32 %v338_v56  ;;  %v337_v59 = vadd.f32 %v332_v58, %v317_v57 }
 0x3d0   :  { %1314 = vtanh.f32 %v337_v59  ;;  %v359_v62 = vrot.slane %v337_v59, 1  ;;  %v494_v59 = vsel %vm493_vm3, 1, %v1522_v27 }
 0x3d2   :  { %v360_v63 = vsel %vm224_vm10, %v338_v56, %v359_v62 }
 0x3d3   :  { %v1620_v1 = vpop.permute.xlu0 %354 }
 0x3d4   :  { %v1313_v60 = vpop.eup %1312  ;;  %vm356_vm7 = vcmp.eq.s32.totalorder %v1620_v1, 1 }
 0x3d5   :  { %345 = vrot.lane.b32.xlu2 %v1313_v60, %s1521_s9 }
 0x3d6   :  { %v1315_v61 = vpop.eup %1314 }
 0x3d7   :  { %343 = vrot.lane.b32.xlu1 %v1315_v61, %s1521_s9 }
 0x3dd   :  { %361 = vrot.lane.b32.xlu2 %v360_v63, %s1524_s12 }
 0x42f   :  { %v346_v0 = vpop.permute.xlu2 %345 }
 0x430   :  { %v350_v8 = vmul.f32 %v346_v0, %v305_v35 }
 0x437   :  { %v362_v2 = vpop.permute.xlu2 %361 }
 0x438   :  { %v1626_v3 = vsel %vm356_vm7, %v362_v2, %v1596_v7 }
 0x439   :  { %v451_v4 = vrot.slane %v1626_v3, 6 }
 0x43b   :  { %453 = vrot.lane.b32.xlu2 %v451_v4, %s1523_s3 }
 0x449   :  { %v344_v5 = vpop.permute.xlu1 %343 }
 0x44a   :  { %v349_v6 = vmul.f32 %v344_v5, %v290_v49 }
 0x44c   :  { %v367_v9 = vrot.slane %v349_v6, 1 }
 0x44e   :  { %v368_v11 = vsel %vm224_vm10, %v350_v8, %v367_v9 }
 0x44f   :  { %369 = vrot.lane.b32.xlu1 %v368_v11, %s1523_s3 }
 0x495   :  { %v454_v54 = vpop.permute.xlu2 %453 }
 0x4c1   :  { %v1632_v12 = vpop.permute.xlu1 %369 }
 0x4c2   :  { %v1638_v7 = vsel %vm356_vm7, %v1632_v12, %v1600_v10  ;;  %v452_v10 = vrot.slane %v1626_v3, 7 }
 0x4c3   :  { %1251 = vmatmul.msk.f32.vlgmr.msra.gmra.mxu3 %vm111_vm13, %v1638_v7 }
 0x546   :  { %v400_v13 = vpop.f32.mrf.mxu3 }
 0x547   :  { %v404_v15 = vrot.slane %v400_v13, 6  ;;  %v405_v17 = vrot.slane %v400_v13, 7 }
 0x549   :  { %v408_v18 = vadd.f32 %v404_v15, %v1573_v16  ;;  %v409_v19 = vadd.f32 %v405_v17, %v1570_v14 }
 0x54b   :  { %1316 = vtanh.f32 %v408_v18  ;;  %v1252_v22 = vmul.f32 -1.442695, %v408_v18  ;;  %v1253_v23 = vmul.f32 -1.442695, %v409_v19 }
 0x54c   :  { %1318 = vtanh.f32 %v409_v19 }
 0x54d   :  { %1320 = vpow2.f32 %v1252_v22 }
 0x54e   :  { %1322 = vpow2.f32 %v1253_v23 }
 0x551   :  { %v1317_v20 = vpop.eup %1316 }
 0x552   :  { %v1319_v21 = vpop.eup %1318  ;;  %463 = vrot.lane.b32.xlu0 %v1317_v20, %s1521_s9 }
 0x553   :  { %465 = vrot.lane.b32.xlu1 %v1319_v21, %s1521_s9  ;;  %v1321_v24 = vpop.eup %1320 }
 0x554   :  { %v1323_v25 = vpop.eup %1322  ;;  %v416_v26 = vadd.f32 1.0, %v1321_v24 }
 0x555   :  { %v417_v28 = vadd.f32 1.0, %v1323_v25 }
 0x556   :  { %1324 = vrcp.f32 %v416_v26  ;;  %v429_v39 = vand.u32 2147483648, %v416_v26  ;;  %vm423_vm11 = vweird.f32 %v416_v26  ;;  %v427_v41 = vand.u32 2147483647, %v416_v26 }
 0x557   :  { %1326 = vrcp.f32 %v417_v28  ;;  %v444_v40 = vand.u32 2147483648, %v417_v28  ;;  %vm438_vm14 = vweird.f32 %v417_v28  ;;  %v442_v42 = vand.u32 2147483647, %v417_v28 }
 0x558   :  { %v430_v45 = vor.u32 1.1754944e-38, %v429_v39  ;;  %vm428_vm1 = vcmp.eq.f32.partialorder %v427_v41, 8.507059e+37 }
 0x559   :  { %v445_v46 = vor.u32 1.1754944e-38, %v444_v40  ;;  %vm443_vm2 = vcmp.eq.f32.partialorder %v442_v42, 8.507059e+37 }
 0x55a   :  { %455 = vrot.lane.b32.xlu0 %v452_v10, %s1523_s3 }
 0x55c   :  { %v1325_v29 = vpop.eup %1324 }
 0x55d   :  { %v1327_v30 = vpop.eup %1326  ;;  %v419_v31 = vmul.f32 %v1325_v29, %v416_v26  ;;  %vm424_vm8 = vweird.f32 %v1325_v29 }
 0x55e   :  { %v434_v32 = vmul.f32 %v1327_v30, %v417_v28  ;;  %vm439_vm9 = vweird.f32 %v1327_v30  ;;  %vm425_vm15 = vmor %vm423_vm11, %vm424_vm8 }
 0x55f   :  { %v420_v33 = vsub.f32 1.0, %v419_v31  ;;  %vm440_vm0 = vmor %vm438_vm14, %vm439_vm9 }
 0x560   :  { %v435_v34 = vsub.f32 1.0, %v434_v32 }
 0x561   :  { %v421_v35 = vmul.f32 %v1325_v29, %v420_v33 }
 0x562   :  { %v436_v36 = vmul.f32 %v1327_v30, %v435_v34 }
 0x563   :  { %v422_v37 = vadd.f32 %v1325_v29, %v421_v35 }
 0x564   :  { %v437_v38 = vadd.f32 %v1327_v30, %v436_v36 }
 0x565   :  { %v426_v43 = vsel %vm425_vm15, %v1325_v29, %v422_v37 }
 0x566   :  { %v441_v44 = vsel %vm440_vm0, %v1327_v30, %v437_v38  ;;  %v431_v48 = vsel %vm428_vm1, %v430_v45, %v426_v43  ;;  %vm637_vm1 = vcmp.gt.s32.totalorder %v1586_v51, 3 }
 0x567   :  { %v446_v50 = vsel %vm443_vm2, %v445_v46, %v441_v44  ;;  %v459_v61 = vmul.f32 %v454_v54, %v431_v48 }
 0x5c4   :  { %v464_v47 = vpop.permute.xlu0 %463 }
 0x5c5   :  { %v466_v49 = vpop.permute.xlu1 %465  ;;  %v469_v52 = vmul.f32 %v464_v47, %v431_v48 }
 0x5c6   :  { %v470_v53 = vmul.f32 %v466_v49, %v446_v50 }
 0x5c7   :  { %473 = vrot.lane.b32.xlu1 %v469_v52, %s1523_s3 }
 0x5c8   :  { %475 = vrot.lane.b32.xlu2 %v470_v53, %s1523_s3 }
 0x5cc   :  { %v456_v55 = vpop.permute.xlu0 %455 }
 0x5cd   :  { %v460_v56 = vmul.f32 %v456_v55, %v446_v50 }
 0x5d0   :  { %496 = vperm.xlu2 %1281, %v494_v59  }
 0x622   :  { %v476_v57 = vpop.permute.xlu2 %475 }
 0x623   :  { %v480_v58 = vadd.f32 %v476_v57, %v460_v56 }
 0x625   :  { %1328 = vtanh.f32 %v480_v58  ;;  %v502_v0 = vrot.slane %v480_v58, 1 }
 0x62a   :  { %v1656_v8 = vpop.permute.xlu2 %496 }
 0x62b   :  { %v1329_v60 = vpop.eup %1328  ;;  %vm498_vm4 = vcmp.eq.s32.totalorder %v1656_v8, 1 }
 0x62c   :  { %487 = vrot.lane.b32.xlu1 %v1329_v60, %s1521_s9 }
 0x639   :  { %v474_v62 = vpop.permute.xlu1 %473 }
 0x63a   :  { %v479_v63 = vadd.f32 %v474_v62, %v459_v61 }
 0x63c   :  { %1330 = vtanh.f32 %v479_v63  ;;  %v501_v2 = vrot.slane %v479_v63, 2 }
 0x63e   :  { %v503_v4 = vsel %vm224_vm10, %v502_v0, %v501_v2  ;;  %v638_v2 = vsel %vm637_vm1, 1, %v1522_v27 }
 0x63f   :  { %504 = vrot.lane.b32.xlu1 %v503_v4, %s1524_s12 }
 0x642   :  { %v1331_v5 = vpop.eup %1330 }
 0x643   :  { %485 = vrot.lane.b32.xlu0 %v1331_v5, %s1521_s9 }
 0x69e   :  { %v488_v6 = vpop.permute.xlu1 %487 }
 0x69f   :  { %v492_v15 = vmul.f32 %v488_v6, %v446_v50 }
 0x6a1   :  { %v511_v19 = vrot.slane %v492_v15, 1 }
 0x6b1   :  { %v505_v9 = vpop.permute.xlu1 %504 }
 0x6b2   :  { %v1662_v11 = vsel %vm498_vm4, %v505_v9, %v1626_v3 }
 0x6b3   :  { %v595_v13 = vrot.slane %v1662_v11, 5 }
 0x6b5   :  { %v486_v17 = vpop.permute.xlu0 %485  ;;  %597 = vrot.lane.b32.xlu1 %v595_v13, %s1523_s3 }
 0x6b6   :  { %v491_v18 = vmul.f32 %v486_v17, %v431_v48 }
 0x6b8   :  { %v510_v20 = vrot.slane %v491_v18, 2 }
 0x6ba   :  { %v512_v21 = vsel %vm224_vm10, %v511_v19, %v510_v20 }
 0x6bb   :  { %513 = vrot.lane.b32.xlu0 %v512_v21, %s1523_s3 }
 0x727   :  { %v598_v61 = vpop.permute.xlu1 %597 }
 0x72d   :  { %v1668_v10 = vpop.permute.xlu0 %513 }
 0x72e   :  { %v1674_v3 = vsel %vm498_vm4, %v1668_v10, %v1638_v7  ;;  %v596_v7 = vrot.slane %v1662_v11, 6 }
 0x72f   :  { %1254 = vmatmul.msk.f32.vlgmr.msrb.gmra.mxu1 %vm111_vm13, %v1674_v3 }
 0x7ac   :  { %v544_v22 = vpop.f32.mrf.mxu1 }
 0x7ad   :  { %v548_v23 = vrot.slane %v544_v22, 5  ;;  %v549_v24 = vrot.slane %v544_v22, 6 }
 0x7af   :  { %v552_v25 = vadd.f32 %v548_v23, %v1573_v16  ;;  %v553_v26 = vadd.f32 %v549_v24, %v1570_v14 }
 0x7b1   :  { %1332 = vtanh.f32 %v552_v25  ;;  %v1255_v30 = vmul.f32 -1.442695, %v552_v25  ;;  %v1256_v34 = vmul.f32 -1.442695, %v553_v26 }
 0x7b2   :  { %1334 = vtanh.f32 %v553_v26 }
 0x7b3   :  { %1336 = vpow2.f32 %v1255_v30 }
 0x7b7   :  { %v1333_v28 = vpop.eup %1332 }
 0x7b8   :  { %v1335_v29 = vpop.eup %1334  ;;  %607 = vrot.lane.b32.xlu2 %v1333_v28, %s1521_s9 }
 0x7b9   :  { %609 = vrot.lane.b32.xlu0 %v1335_v29, %s1521_s9  ;;  %v1337_v31 = vpop.eup %1336 }
 0x7ba   :  { %v560_v32 = vadd.f32 1.0, %v1337_v31 }
 0x7bc   :  { %1338 = vrcp.f32 %v560_v32  ;;  %v573_v41 = vand.u32 2147483648, %v560_v32  ;;  %vm567_vm6 = vweird.f32 %v560_v32  ;;  %v571_v42 = vand.u32 2147483647, %v560_v32 }
 0x7bd   :  { %1340 = vpow2.f32 %v1256_v34 }
 0x7be   :  { %v574_v44 = vor.u32 1.1754944e-38, %v573_v41  ;;  %vm572_vm9 = vcmp.eq.f32.partialorder %v571_v42, 8.507059e+37 }
 0x7c0   :  { %599 = vrot.lane.b32.xlu2 %v596_v7, %s1523_s3 }
 0x7c2   :  { %v1339_v33 = vpop.eup %1338 }
 0x7c3   :  { %v563_v35 = vmul.f32 %v1339_v33, %v560_v32  ;;  %v1341_v38 = vpop.eup %1340  ;;  %vm568_vm5 = vweird.f32 %v1339_v33 }
 0x7c4   :  { %v561_v39 = vadd.f32 1.0, %v1341_v38  ;;  %vm569_vm8 = vmor %vm567_vm6, %vm568_vm5 }
 0x7c5   :  { %v564_v36 = vsub.f32 1.0, %v563_v35 }
 0x7c6   :  { %1342 = vrcp.f32 %v561_v39  ;;  %v588_v54 = vand.u32 2147483648, %v561_v39  ;;  %vm582_vm14 = vweird.f32 %v561_v39  ;;  %v586_v55 = vand.u32 2147483647, %v561_v39 }
 0x7c7   :  { %v565_v37 = vmul.f32 %v1339_v33, %v564_v36 }
 0x7c8   :  { %v589_v57 = vor.u32 1.1754944e-38, %v588_v54  ;;  %vm587_vm0 = vcmp.eq.f32.partialorder %v586_v55, 8.507059e+37 }
 0x7c9   :  { %v566_v40 = vadd.f32 %v1339_v33, %v565_v37 }
 0x7cb   :  { %v570_v43 = vsel %vm569_vm8, %v1339_v33, %v566_v40 }
 0x7cc   :  { %v575_v46 = vsel %vm572_vm9, %v574_v44, %v570_v43  ;;  %v1343_v48 = vpop.eup %1342  ;;  %vm781_vm9 = vcmp.gt.s32.totalorder %v1586_v51, 4 }
 0x7cd   :  { %v578_v49 = vmul.f32 %v1343_v48, %v561_v39  ;;  %vm583_vm11 = vweird.f32 %v1343_v48  ;;  %v603_v62 = vmul.f32 %v598_v61, %v575_v46 }
 0x7ce   :  { %vm584_vm15 = vmor %vm582_vm14, %vm583_vm11 }
 0x7cf   :  { %v579_v50 = vsub.f32 1.0, %v578_v49 }
 0x7d1   :  { %v580_v52 = vmul.f32 %v1343_v48, %v579_v50 }
 0x7d3   :  { %v581_v53 = vadd.f32 %v1343_v48, %v580_v52 }
 0x7d5   :  { %v585_v56 = vsel %vm584_vm15, %v1343_v48, %v581_v53 }
 0x7d6   :  { %v590_v58 = vsel %vm587_vm0, %v589_v57, %v585_v56 }
 0x812   :  { %v608_v45 = vpop.permute.xlu2 %607 }
 0x813   :  { %v613_v47 = vmul.f32 %v608_v45, %v575_v46 }
 0x815   :  { %617 = vrot.lane.b32.xlu0 %v613_v47, %s1523_s3 }
 0x81a   :  { %v600_v5 = vpop.permute.xlu2 %599 }
 0x81b   :  { %v604_v6 = vmul.f32 %v600_v5, %v590_v58 }
 0x82b   :  { %v610_v59 = vpop.permute.xlu0 %609 }
 0x82c   :  { %v614_v60 = vmul.f32 %v610_v59, %v590_v58 }
 0x82e   :  { %619 = vrot.lane.b32.xlu1 %v614_v60, %s1523_s3  ;;  %v782_v60 = vsel %vm781_vm9, 1, %v1522_v27 }
 0x836   :  { %640 = vperm.xlu1 %1282, %v638_v2  }
 0x887   :  { %v618_v63 = vpop.permute.xlu0 %617 }
 0x888   :  { %v623_v0 = vadd.f32 %v618_v63, %v603_v62 }
 0x88a   :  { %1344 = vtanh.f32 %v623_v0  ;;  %v645_v18 = vrot.slane %v623_v0, 3 }
 0x890   :  { %v1345_v4 = vpop.eup %1344 }
 0x891   :  { %629 = vrot.lane.b32.xlu2 %v1345_v4, %s1521_s9 }
 0x8a0   :  { %v620_v9 = vpop.permute.xlu1 %619 }
 0x8a1   :  { %v624_v13 = vadd.f32 %v620_v9, %v604_v6 }
 0x8a3   :  { %1346 = vtanh.f32 %v624_v13  ;;  %v646_v17 = vrot.slane %v624_v13, 2 }
 0x8a5   :  { %v647_v19 = vsel %vm224_vm10, %v646_v17, %v645_v18 }
 0x8a8   :  { %v1692_v26 = vpop.permute.xlu1 %640 }
 0x8a9   :  { %v1347_v15 = vpop.eup %1346  ;;  %vm642_vm2 = vcmp.eq.s32.totalorder %v1692_v26, 1 }
 0x8aa   :  { %631 = vrot.lane.b32.xlu0 %v1347_v15, %s1521_s9 }
 0x8b2   :  { %648 = vrot.lane.b32.xlu0 %v647_v19, %s1524_s12 }
 0x8eb   :  { %v630_v20 = vpop.permute.xlu2 %629 }
 0x8ec   :  { %v635_v21 = vmul.f32 %v630_v20, %v575_v46 }
 0x8ee   :  { %v654_v24 = vrot.slane %v635_v21, 3 }
 0x91c   :  { %v632_v22 = vpop.permute.xlu0 %631 }
 0x91d   :  { %v636_v23 = vmul.f32 %v632_v22, %v590_v58 }
 0x91f   :  { %v655_v25 = vrot.slane %v636_v23, 2 }
 0x921   :  { %v656_v28 = vsel %vm224_vm10, %v655_v25, %v654_v24 }
 0x922   :  { %657 = vrot.lane.b32.xlu2 %v656_v28, %s1523_s3 }
 0x924   :  { %v649_v29 = vpop.permute.xlu0 %648 }
 0x925   :  { %v1700_v7 = vsel %vm642_vm2, %v649_v29, %v1662_v11 }
 0x926   :  { %v739_v30 = vrot.slane %v1700_v7, 4 }
 0x928   :  { %741 = vrot.lane.b32.xlu0 %v739_v30, %s1523_s3 }
 0x97c   :  { %v1704_v31 = vpop.permute.xlu2 %657 }
 0x97d   :  { %v1710_v32 = vsel %vm642_vm2, %v1704_v31, %v1674_v3  ;;  %v740_v3 = vrot.slane %v1700_v7, 5 }
 0x97e   :  { %1257 = vmatmul.msk.f32.vlgmr.msrb.gmra.mxu2 %vm111_vm13, %v1710_v32 }
 0x99a   :  { %v742_v15 = vpop.permute.xlu0 %741 }
 0xa01   :  { %v688_v33 = vpop.f32.mrf.mxu2 }
 0xa02   :  { %v692_v34 = vrot.slane %v688_v33, 4  ;;  %v693_v35 = vrot.slane %v688_v33, 5 }
 0xa04   :  { %v696_v11 = vadd.f32 %v692_v34, %v1573_v16  ;;  %v697_v36 = vadd.f32 %v693_v35, %v1570_v14 }
 0xa06   :  { %1348 = vtanh.f32 %v696_v11  ;;  %v1259_v39 = vmul.f32 -1.442695, %v697_v36  ;;  %v1258_v43 = vmul.f32 -1.442695, %v696_v11 }
 0xa07   :  { %1350 = vtanh.f32 %v697_v36 }
 0xa08   :  { %1352 = vpow2.f32 %v1259_v39 }
 0xa0c   :  { %v1349_v37 = vpop.eup %1348 }
 0xa0d   :  { %v1351_v38 = vpop.eup %1350  ;;  %751 = vrot.lane.b32.xlu1 %v1349_v37, %s1521_s9 }
 0xa0e   :  { %753 = vrot.lane.b32.xlu2 %v1351_v38, %s1521_s9  ;;  %v1353_v40 = vpop.eup %1352 }
 0xa0f   :  { %v705_v41 = vadd.f32 1.0, %v1353_v40 }
 0xa11   :  { %1354 = vrcp.f32 %v705_v41  ;;  %v732_v50 = vand.u32 2147483648, %v705_v41  ;;  %vm726_vm5 = vweird.f32 %v705_v41  ;;  %v730_v52 = vand.u32 2147483647, %v705_v41 }
 0xa12   :  { %1356 = vpow2.f32 %v1258_v43 }
 0xa13   :  { %v733_v54 = vor.u32 1.1754944e-38, %v732_v50  ;;  %vm731_vm8 = vcmp.eq.f32.partialorder %v730_v52, 8.507059e+37 }
 0xa15   :  { %743 = vrot.lane.b32.xlu1 %v740_v3, %s1523_s3 }
 0xa17   :  { %v1355_v42 = vpop.eup %1354 }
 0xa18   :  { %v722_v44 = vmul.f32 %v1355_v42, %v705_v41  ;;  %v1357_v46 = vpop.eup %1356  ;;  %vm727_vm3 = vweird.f32 %v1355_v42 }
 0xa19   :  { %v704_v48 = vadd.f32 1.0, %v1357_v46  ;;  %vm728_vm6 = vmor %vm726_vm5, %vm727_vm3 }
 0xa1a   :  { %v723_v45 = vsub.f32 1.0, %v722_v44 }
 0xa1b   :  { %1358 = vrcp.f32 %v704_v48  ;;  %v717_v0 = vand.u32 2147483648, %v704_v48  ;;  %vm711_vm14 = vweird.f32 %v704_v48  ;;  %v715_v2 = vand.u32 2147483647, %v704_v48 }
 0xa1c   :  { %v724_v47 = vmul.f32 %v1355_v42, %v723_v45 }
 0xa1d   :  { %v718_v5 = vor.u32 1.1754944e-38, %v717_v0  ;;  %vm716_vm0 = vcmp.eq.f32.partialorder %v715_v2, 8.507059e+37 }
 0xa1e   :  { %v725_v49 = vadd.f32 %v1355_v42, %v724_v47 }
 0xa20   :  { %v729_v53 = vsel %vm728_vm6, %v1355_v42, %v725_v49 }
 0xa21   :  { %v734_v56 = vsel %vm731_vm8, %v733_v54, %v729_v53  ;;  %v1359_v57 = vpop.eup %1358 }
 0xa22   :  { %v707_v59 = vmul.f32 %v1359_v57, %v704_v48  ;;  %vm712_vm11 = vweird.f32 %v1359_v57 }
 0xa23   :  { %vm713_vm15 = vmor %vm711_vm14, %vm712_vm11 }
 0xa24   :  { %v708_v61 = vsub.f32 1.0, %v707_v59 }
 0xa26   :  { %v709_v62 = vmul.f32 %v1359_v57, %v708_v61 }
 0xa28   :  { %v710_v63 = vadd.f32 %v1359_v57, %v709_v62 }
 0xa2a   :  { %v714_v4 = vsel %vm713_vm15, %v1359_v57, %v710_v63  ;;  %vm920_vm15 = vcmp.gt.s32.totalorder %v1586_v51, 5 }
 0xa2b   :  { %v719_v9 = vsel %vm716_vm0, %v718_v5, %v714_v4 }
 0xa2c   :  { %v747_v18 = vmul.f32 %v742_v15, %v719_v9 }
 0xa68   :  { %v754_v55 = vpop.permute.xlu2 %753 }
 0xa69   :  { %v758_v58 = vmul.f32 %v754_v55, %v734_v56 }
 0xa6b   :  { %763 = vrot.lane.b32.xlu0 %v758_v58, %s1523_s3 }
 0xa73   :  { %784 = vperm.xlu0 %1280, %v782_v60  }
 0xa7f   :  { %v752_v6 = vpop.permute.xlu1 %751 }
 0xa80   :  { %v757_v13 = vmul.f32 %v752_v6, %v719_v9 }
 0xa82   :  { %761 = vrot.lane.b32.xlu2 %v757_v13, %s1523_s3 }
 0xa87   :  { %v744_v17 = vpop.permute.xlu1 %743 }
 0xa88   :  { %v748_v19 = vmul.f32 %v744_v17, %v734_v56 }
 0xadc   :  { %v762_v20 = vpop.permute.xlu2 %761 }
 0xadd   :  { %v767_v21 = vadd.f32 %v762_v20, %v747_v18  ;;  %v764_v22 = vpop.permute.xlu0 %763 }
 0xade   :  { %v768_v23 = vadd.f32 %v764_v22, %v748_v19 }
 0xadf   :  { %1360 = vtanh.f32 %v767_v21  ;;  %v789_v28 = vrot.slane %v767_v21, 4 }
 0xae0   :  { %1362 = vtanh.f32 %v768_v23  ;;  %v790_v29 = vrot.slane %v768_v23, 3 }
 0xae2   :  { %v791_v30 = vsel %vm224_vm10, %v790_v29, %v789_v28  ;;  %v921_v29 = vsel %vm920_vm15, 1, %v1522_v27 }
 0xae5   :  { %v1361_v24 = vpop.eup %1360  ;;  %v785_v34 = vpop.permute.xlu0 %784 }
 0xae6   :  { %v1363_v25 = vpop.eup %1362  ;;  %773 = vrot.lane.b32.xlu1 %v1361_v24, %s1521_s9  ;;  %vm786_vm1 = vcmp.eq.s32.totalorder %v785_v34, 1 }
 0xae7   :  { %775 = vrot.lane.b32.xlu2 %v1363_v25, %s1521_s9 }
 0xaef   :  { %792 = vrot.lane.b32.xlu2 %v791_v30, %s1524_s12 }
 0xb41   :  { %v776_v33 = vpop.permute.xlu2 %775 }
 0xb42   :  { %v780_v37 = vmul.f32 %v776_v33, %v734_v56 }
 0xb44   :  { %v799_v39 = vrot.slane %v780_v37, 3 }
 0xb49   :  { %v793_v35 = vpop.permute.xlu2 %792 }
 0xb4a   :  { %v1729_v11 = vsel %vm786_vm1, %v793_v35, %v1700_v7 }
 0xb4b   :  { %v878_v36 = vrot.slane %v1729_v11, 3 }
 0xb4d   :  { %880 = vrot.lane.b32.xlu2 %v878_v36, %s1523_s3 }
 0xb58   :  { %v774_v38 = vpop.permute.xlu1 %773 }
 0xb59   :  { %v779_v3 = vmul.f32 %v774_v38, %v719_v9 }
 0xb5b   :  { %v798_v40 = vrot.slane %v779_v3, 4 }
 0xb5d   :  { %v800_v41 = vsel %vm224_vm10, %v799_v39, %v798_v40 }
 0xb5e   :  { %801 = vrot.lane.b32.xlu1 %v800_v41, %s1523_s3 }
 0xba7   :  { %v881_v30 = vpop.permute.xlu2 %880 }
 0xbd0   :  { %v802_v42 = vpop.permute.xlu1 %801 }
 0xbd1   :  { %v1736_v43 = vsel %vm786_vm1, %v802_v42, %v1710_v32  ;;  %v805_v44 = vsel %vm786_vm1, %v802_v42, 0.0  ;;  %v879_v32 = vrot.slane %v1729_v11, 4 }
 0xbd2   :  { %806 = vst.msk [vmem:[#allocation8 + $0x2] sm:$0x3] %vm238_vm12, %v805_v44  ;;  %1260 = vmatmul.msk.f32.vlgmr.msrb.gmra.mxu3 %vm111_vm13, %v1736_v43 }
 0xc55   :  { %v827_v7 = vpop.f32.mrf.mxu3 }
 0xc56   :  { %v831_v45 = vrot.slane %v827_v7, 3  ;;  %v832_v46 = vrot.slane %v827_v7, 4 }
 0xc58   :  { %v835_v47 = vadd.f32 %v831_v45, %v1573_v16  ;;  %v836_v48 = vadd.f32 %v832_v46, %v1570_v14 }
 0xc5a   :  { %1364 = vtanh.f32 %v835_v47  ;;  %v1261_v52 = vmul.f32 -1.442695, %v835_v47  ;;  %v1262_v53 = vmul.f32 -1.442695, %v836_v48 }
 0xc5b   :  { %1366 = vtanh.f32 %v836_v48 }
 0xc5c   :  { %1368 = vpow2.f32 %v1261_v52 }
 0xc5d   :  { %1370 = vpow2.f32 %v1262_v53 }
 0xc60   :  { %v1365_v49 = vpop.eup %1364 }
 0xc61   :  { %v1367_v50 = vpop.eup %1366  ;;  %890 = vrot.lane.b32.xlu0 %v1365_v49, %s1521_s9 }
 0xc62   :  { %892 = vrot.lane.b32.xlu1 %v1367_v50, %s1521_s9  ;;  %v1369_v54 = vpop.eup %1368 }
 0xc63   :  { %v1371_v55 = vpop.eup %1370  ;;  %v843_v56 = vadd.f32 1.0, %v1369_v54 }
 0xc64   :  { %v844_v57 = vadd.f32 1.0, %v1371_v55 }
 0xc65   :  { %1372 = vrcp.f32 %v843_v56  ;;  %v856_v6 = vand.u32 2147483648, %v843_v56  ;;  %vm850_vm5 = vweird.f32 %v843_v56  ;;  %v854_v13 = vand.u32 2147483647, %v843_v56 }
 0xc66   :  { %1374 = vrcp.f32 %v844_v57  ;;  %v871_v9 = vand.u32 2147483648, %v844_v57  ;;  %vm865_vm6 = vweird.f32 %v844_v57  ;;  %v869_v15 = vand.u32 2147483647, %v844_v57 }
 0xc67   :  { %v857_v19 = vor.u32 1.1754944e-38, %v856_v6  ;;  %vm855_vm11 = vcmp.eq.f32.partialorder %v854_v13, 8.507059e+37 }
 0xc68   :  { %v872_v20 = vor.u32 1.1754944e-38, %v871_v9  ;;  %vm870_vm14 = vcmp.eq.f32.partialorder %v869_v15, 8.507059e+37 }
 0xc69   :  { %882 = vrot.lane.b32.xlu0 %v879_v32, %s1523_s3 }
 0xc6b   :  { %v1373_v58 = vpop.eup %1372 }
 0xc6c   :  { %v1375_v59 = vpop.eup %1374  ;;  %v846_v60 = vmul.f32 %v1373_v58, %v843_v56  ;;  %vm851_vm12 = vweird.f32 %v1373_v58 }
 0xc6d   :  { %v861_v61 = vmul.f32 %v1375_v59, %v844_v57  ;;  %vm866_vm3 = vweird.f32 %v1375_v59  ;;  %vm852_vm8 = vmor %vm850_vm5, %vm851_vm12 }
 0xc6e   :  { %v847_v62 = vsub.f32 1.0, %v846_v60  ;;  %vm867_vm9 = vmor %vm865_vm6, %vm866_vm3 }
 0xc6f   :  { %v862_v63 = vsub.f32 1.0, %v861_v61 }
 0xc70   :  { %v848_v0 = vmul.f32 %v1373_v58, %v847_v62 }
 0xc71   :  { %v863_v2 = vmul.f32 %v1375_v59, %v862_v63 }
 0xc72   :  { %v849_v4 = vadd.f32 %v1373_v58, %v848_v0 }
 0xc73   :  { %v864_v5 = vadd.f32 %v1375_v59, %v863_v2 }
 0xc74   :  { %v853_v17 = vsel %vm852_vm8, %v1373_v58, %v849_v4 }
 0xc75   :  { %v868_v18 = vsel %vm867_vm9, %v1375_v59, %v864_v5  ;;  %v858_v22 = vsel %vm855_vm11, %v857_v19, %v853_v17 }
 0xc76   :  { %v873_v24 = vsel %vm870_vm14, %v872_v20, %v868_v18  ;;  %v886_v38 = vmul.f32 %v881_v30, %v858_v22 }
 0xcd3   :  { %v891_v21 = vpop.permute.xlu0 %890 }
 0xcd4   :  { %v893_v23 = vpop.permute.xlu1 %892  ;;  %v896_v25 = vmul.f32 %v891_v21, %v858_v22 }
 0xcd5   :  { %v897_v28 = vmul.f32 %v893_v23, %v873_v24 }
 0xcd6   :  { %900 = vrot.lane.b32.xlu1 %v896_v25, %s1523_s3 }
 0xcd7   :  { %902 = vrot.lane.b32.xlu2 %v897_v28, %s1523_s3 }
 0xcdb   :  { %v883_v33 = vpop.permute.xlu0 %882 }
 0xcdc   :  { %v887_v34 = vmul.f32 %v883_v33, %v873_v24 }
 0xcdf   :  { %923 = vperm.xlu2 %1281, %v921_v29  }
 0xd31   :  { %v903_v35 = vpop.permute.xlu2 %902 }
 0xd32   :  { %v907_v36 = vadd.f32 %v903_v35, %v887_v34 }
 0xd34   :  { %1376 = vtanh.f32 %v907_v36  ;;  %v929_v40 = vrot.slane %v907_v36, 4 }
 0xd39   :  { %v1755_v7 = vpop.permute.xlu2 %923 }
 0xd3a   :  { %v1377_v37 = vpop.eup %1376  ;;  %vm925_vm0 = vcmp.eq.s32.totalorder %v1755_v7, 1 }
 0xd3b   :  { %914 = vrot.lane.b32.xlu1 %v1377_v37, %s1521_s9 }
 0xd48   :  { %v901_v3 = vpop.permute.xlu1 %900 }
 0xd49   :  { %v906_v39 = vadd.f32 %v901_v3, %v886_v38 }
 0xd4b   :  { %1378 = vtanh.f32 %v906_v39  ;;  %v928_v41 = vrot.slane %v906_v39, 5 }
 0xd4d   :  { %v930_v51 = vsel %vm224_vm10, %v929_v40, %v928_v41  ;;  %v1788_v40 = vld [vmem:[%s1855_s4] sm:$0x3]  ;;  %s1525_s4 = smov [#allocation8]  }
 0xd4e   :  { %931 = vrot.lane.b32.xlu1 %v930_v51, %s1524_s12  ;;  %vm1063_vm14 = vcmp.gt.s32.totalorder %v1788_v40, 6  ;;  %s1231_s15 = sshll.u32 %s1525_s4, 4  ;;  %s1232_s15 = int_to_ptr.vmem [resolvable:$true] %s1231_s15 }
 0xd4f   :  { %v1064_v41 = vsel %vm1063_vm14, 1, %v1522_v27  ;;  %vm666_vm14 = vcmask 1042176  }
 0xd51   :  { %v1379_v42 = vpop.eup %1378 }
 0xd52   :  { %912 = vrot.lane.b32.xlu0 %v1379_v42, %s1521_s9 }
 0xdad   :  { %v915_v44 = vpop.permute.xlu1 %914 }
 0xdae   :  { %v919_v48 = vmul.f32 %v915_v44, %v873_v24 }
 0xdb0   :  { %v938_v32 = vrot.slane %v919_v48, 4 }
 0xdc0   :  { %v932_v45 = vpop.permute.xlu1 %931 }
 0xdc1   :  { %v1761_v46 = vsel %vm925_vm0, %v932_v45, %v1729_v11 }
 0xdc2   :  { %v1021_v47 = vrot.slane %v1761_v46, 2 }
 0xdc4   :  { %v913_v49 = vpop.permute.xlu0 %912  ;;  %1023 = vrot.lane.b32.xlu1 %v1021_v47, %s1523_s3 }
 0xdc5   :  { %v918_v50 = vmul.f32 %v913_v49, %v858_v22 }
 0xdc7   :  { %v937_v52 = vrot.slane %v918_v50, 5 }
 0xdc9   :  { %v939_v53 = vsel %vm224_vm10, %v938_v32, %v937_v52 }
 0xdca   :  { %940 = vrot.lane.b32.xlu0 %v939_v53, %s1523_s3 }
 0xe36   :  { %v1024_v51 = vpop.permute.xlu1 %1023 }
 0xe3c   :  { %v1767_v54 = vpop.permute.xlu0 %940 }
 0xe3d   :  { %v1773_v11 = vsel %vm925_vm0, %v1767_v54, %v1736_v43  ;;  %v1022_v43 = vrot.slane %v1761_v46, 3 }
 0xe3e   :  { %1263 = vmatmul.msk.f32.vlgmr.msrb.gmra.mxu0 %vm111_vm13, %v1773_v11 }
 0xebb   :  { %v970_v55 = vpop.f32.mrf.mxu0 }
 0xebc   :  { %v974_v56 = vrot.slane %v970_v55, 2  ;;  %v975_v57 = vrot.slane %v970_v55, 3 }
 0xebe   :  { %v978_v58 = vadd.f32 %v974_v56, %v1573_v16  ;;  %v979_v59 = vadd.f32 %v975_v57, %v1570_v14 }
 0xec0   :  { %1380 = vtanh.f32 %v978_v58  ;;  %v1264_v62 = vmul.f32 -1.442695, %v978_v58  ;;  %v1265_v4 = vmul.f32 -1.442695, %v979_v59 }
 0xec1   :  { %1382 = vtanh.f32 %v979_v59 }
 0xec2   :  { %1384 = vpow2.f32 %v1264_v62 }
 0xec6   :  { %v1381_v60 = vpop.eup %1380 }
 0xec7   :  { %v1383_v61 = vpop.eup %1382  ;;  %1033 = vrot.lane.b32.xlu2 %v1381_v60, %s1521_s9 }
 0xec8   :  { %1035 = vrot.lane.b32.xlu0 %v1383_v61, %s1521_s9  ;;  %v1385_v63 = vpop.eup %1384 }
 0xec9   :  { %v986_v0 = vadd.f32 1.0, %v1385_v63 }
 0xecb   :  { %1386 = vrcp.f32 %v986_v0  ;;  %v999_v18 = vand.u32 2147483648, %v986_v0  ;;  %vm993_vm12 = vweird.f32 %v986_v0  ;;  %v997_v19 = vand.u32 2147483647, %v986_v0 }
 0xecc   :  { %1388 = vpow2.f32 %v1265_v4 }
 0xecd   :  { %v1000_v21 = vor.u32 1.1754944e-38, %v999_v18  ;;  %vm998_vm5 = vcmp.eq.f32.partialorder %v997_v19, 8.507059e+37 }
 0xecf   :  { %1025 = vrot.lane.b32.xlu2 %v1022_v43, %s1523_s3 }
 0xed1   :  { %v1387_v2 = vpop.eup %1386 }
 0xed2   :  { %v989_v5 = vmul.f32 %v1387_v2, %v986_v0  ;;  %v1389_v13 = vpop.eup %1388  ;;  %vm994_vm1 = vweird.f32 %v1387_v2 }
 0xed3   :  { %v987_v15 = vadd.f32 1.0, %v1389_v13  ;;  %vm995_vm3 = vmor %vm993_vm12, %vm994_vm1 }
 0xed4   :  { %v990_v6 = vsub.f32 1.0, %v989_v5 }
 0xed5   :  { %1390 = vrcp.f32 %v987_v15  ;;  %v1014_v34 = vand.u32 2147483648, %v987_v15  ;;  %vm1008_vm8 = vweird.f32 %v987_v15  ;;  %v1012_v35 = vand.u32 2147483647, %v987_v15 }
 0xed6   :  { %v991_v9 = vmul.f32 %v1387_v2, %v990_v6 }
 0xed7   :  { %v1015_v37 = vor.u32 1.1754944e-38, %v1014_v34  ;;  %vm1013_vm11 = vcmp.eq.f32.partialorder %v1012_v35, 8.507059e+37 }
 0xed8   :  { %v992_v17 = vadd.f32 %v1387_v2, %v991_v9 }
 0xeda   :  { %v996_v20 = vsel %vm995_vm3, %v1387_v2, %v992_v17 }
 0xedb   :  { %v1001_v23 = vsel %vm998_vm5, %v1000_v21, %v996_v20  ;;  %v1391_v25 = vpop.eup %1390  ;;  %vm1206_vm5 = vcmp.gt.s32.totalorder %v1788_v40, 7 }
 0xedc   :  { %v1004_v28 = vmul.f32 %v1391_v25, %v987_v15  ;;  %vm1009_vm6 = vweird.f32 %v1391_v25  ;;  %v1029_v42 = vmul.f32 %v1024_v51, %v1001_v23  ;;  %v1207_v51 = vsel %vm1206_vm5, 1, %v1522_v27 }
 0xedd   :  { %vm1010_vm9 = vmor %vm1008_vm8, %vm1009_vm6 }
 0xede   :  { %v1005_v29 = vsub.f32 1.0, %v1004_v28 }
 0xee0   :  { %v1006_v30 = vmul.f32 %v1391_v25, %v1005_v29 }
 0xee2   :  { %v1007_v33 = vadd.f32 %v1391_v25, %v1006_v30 }
 0xee4   :  { %v1011_v36 = vsel %vm1010_vm9, %v1391_v25, %v1007_v33 }
 0xee5   :  { %v1016_v38 = vsel %vm1013_vm11, %v1015_v37, %v1011_v36 }
 0xf21   :  { %v1034_v22 = vpop.permute.xlu2 %1033 }
 0xf22   :  { %v1039_v24 = vmul.f32 %v1034_v22, %v1001_v23 }
 0xf24   :  { %1043 = vrot.lane.b32.xlu0 %v1039_v24, %s1523_s3 }
 0xf29   :  { %v1026_v48 = vpop.permute.xlu2 %1025 }
 0xf2a   :  { %v1030_v49 = vmul.f32 %v1026_v48, %v1016_v38  ;;  %v944_v48 = vsel %vm925_vm0, %v1767_v54, 0.0  ;;  %vm522_vm0 = vcmask 779776  }
 0xf3a   :  { %v1036_v3 = vpop.permute.xlu0 %1035 }
 0xf3b   :  { %v1040_v39 = vmul.f32 %v1036_v3, %v1016_v38 }
 0xf3d   :  { %1045 = vrot.lane.b32.xlu1 %v1040_v39, %s1523_s3 }
 0xf45   :  { %1066 = vperm.xlu1 %1282, %v1064_v41  }
 0xf96   :  { %v1044_v44 = vpop.permute.xlu0 %1043 }
 0xf97   :  { %v1049_v45 = vadd.f32 %v1044_v44, %v1029_v42 }
 0xf99   :  { %1392 = vtanh.f32 %v1049_v45  ;;  %v1071_v55 = vrot.slane %v1049_v45, 6 }
 0xf9f   :  { %v1393_v47 = vpop.eup %1392 }
 0xfa0   :  { %1055 = vrot.lane.b32.xlu2 %v1393_v47, %s1521_s9 }
 0xfaf   :  { %v1046_v50 = vpop.permute.xlu1 %1045 }
 0xfb0   :  { %v1050_v32 = vadd.f32 %v1046_v50, %v1030_v49 }
 0xfb2   :  { %1394 = vtanh.f32 %v1050_v32  ;;  %v1072_v53 = vrot.slane %v1050_v32, 5 }
 0xfb4   :  { %v1073_v56 = vsel %vm224_vm10, %v1072_v53, %v1071_v55  ;;  %v661_v53 = vsel %vm642_vm2, %v1704_v31, 0.0  ;;  %vm378_vm2 = vcmask 517376   ;;  %v373_v31 = vsel %vm356_vm7, %v1632_v12, 0.0 }
 0xfb7   :  { %v1796_v62 = vpop.permute.xlu1 %1066 }
 0xfb8   :  { %v1395_v52 = vpop.eup %1394  ;;  %vm1068_vm15 = vcmp.eq.s32.totalorder %v1796_v62, 1  ;;  %v517_v62 = vsel %vm498_vm4, %v1668_v10, 0.0 }
 0xfb9   :  { %1057 = vrot.lane.b32.xlu0 %v1395_v52, %s1521_s9 }
 0xfc1   :  { %1074 = vrot.lane.b32.xlu0 %v1073_v56, %s1524_s12 }
 0xffa   :  { %v1056_v57 = vpop.permute.xlu2 %1055 }
 0xffb   :  { %v1061_v58 = vmul.f32 %v1056_v57, %v1001_v23 }
 0xffd   :  { %v1080_v61 = vrot.slane %v1061_v58, 6 }
0x102b   :  { %v1058_v59 = vpop.permute.xlu0 %1057 }
0x102c   :  { %v1062_v60 = vmul.f32 %v1058_v59, %v1016_v38 }
0x102e   :  { %v1081_v43 = vrot.slane %v1062_v60, 5 }
0x1030   :  { %v1082_v63 = vsel %vm224_vm10, %v1081_v43, %v1080_v61 }
0x1031   :  { %1083 = vrot.lane.b32.xlu2 %v1082_v63, %s1523_s3 }
0x1033   :  { %v1075_v0 = vpop.permute.xlu0 %1074 }
0x1034   :  { %v1077_v2 = vsel %vm1068_vm15, %v1075_v0, %v1761_v46 }
0x1035   :  { %v1164_v4 = vrot.slane %v1077_v2, 1  ;;  %v1165_v20 = vrot.slane %v1077_v2, 2 }
0x1037   :  { %1166 = vrot.lane.b32.xlu0 %v1164_v4, %s1523_s3 }
0x108b   :  { %v1805_v5 = vpop.permute.xlu2 %1083 }
0x108c   :  { %v1086_v6 = vsel %vm1068_vm15, %v1805_v5, %v1773_v11  ;;  %v1087_v0 = vsel %vm1068_vm15, %v1805_v5, 0.0 }
0x108d   :  { %1266 = vmatmul.msk.f32.vlgmr.msra.gmra.mxu1 %vm111_vm13, %v1086_v6 }
0x10a9   :  { %v1167_v7 = vpop.permute.xlu0 %1166 }
0x110a   :  { %v1113_v9 = vpop.f32.mrf.mxu1 }
0x110b   :  { %v1117_v13 = vrot.slane %v1113_v9, 1  ;;  %v1118_v15 = vrot.slane %v1113_v9, 2 }
0x110d   :  { %v1121_v17 = vadd.f32 %v1117_v13, %v1573_v16  ;;  %v1122_v18 = vadd.f32 %v1118_v15, %v1570_v14 }
0x110f   :  { %1396 = vtanh.f32 %v1121_v17  ;;  %v1268_v11 = vmul.f32 -1.442695, %v1122_v18  ;;  %v1267_v16 = vmul.f32 -1.442695, %v1121_v17 }
0x1110   :  { %1398 = vtanh.f32 %v1122_v18 }
0x1111   :  { %1400 = vpow2.f32 %v1268_v11 }
0x1115   :  { %v1397_v46 = vpop.eup %1396 }
0x1116   :  { %v1399_v19 = vpop.eup %1398  ;;  %1176 = vrot.lane.b32.xlu1 %v1397_v46, %s1521_s9 }
0x1117   :  { %1178 = vrot.lane.b32.xlu2 %v1399_v19, %s1521_s9  ;;  %v1401_v21 = vpop.eup %1400 }
0x1118   :  { %v1130_v22 = vadd.f32 1.0, %v1401_v21 }
0x111a   :  { %1402 = vrcp.f32 %v1130_v22  ;;  %v1157_v33 = vand.u32 2147483648, %v1130_v22  ;;  %vm1151_vm1 = vweird.f32 %v1130_v22  ;;  %v1155_v34 = vand.u32 2147483647, %v1130_v22 }
0x111b   :  { %1404 = vpow2.f32 %v1267_v16 }
0x111c   :  { %v1158_v36 = vor.u32 1.1754944e-38, %v1157_v33  ;;  %vm1156_vm3 = vcmp.eq.f32.partialorder %v1155_v34, 8.507059e+37 }
0x111e   :  { %1168 = vrot.lane.b32.xlu1 %v1165_v20, %s1523_s3 }
0x1120   :  { %v1403_v23 = vpop.eup %1402 }
0x1121   :  { %v1147_v24 = vmul.f32 %v1403_v23, %v1130_v22  ;;  %v1405_v25 = vpop.eup %1404  ;;  %vm1152_vm13 = vweird.f32 %v1403_v23 }
0x1122   :  { %v1129_v29 = vadd.f32 1.0, %v1405_v25  ;;  %vm1153_vm12 = vmor %vm1151_vm1, %vm1152_vm13 }
0x1123   :  { %v1148_v14 = vsub.f32 1.0, %v1147_v24 }
0x1124   :  { %1406 = vrcp.f32 %v1129_v29  ;;  %v1142_v47 = vand.u32 2147483648, %v1129_v29  ;;  %vm1136_vm8 = vweird.f32 %v1129_v29  ;;  %v1140_v49 = vand.u32 2147483647, %v1129_v29 }
0x1125   :  { %v1149_v28 = vmul.f32 %v1403_v23, %v1148_v14 }
0x1126   :  { %v1143_v32 = vor.u32 1.1754944e-38, %v1142_v47  ;;  %vm1141_vm11 = vcmp.eq.f32.partialorder %v1140_v49, 8.507059e+37 }
0x1127   :  { %v1150_v30 = vadd.f32 %v1403_v23, %v1149_v28 }
0x1129   :  { %v1154_v35 = vsel %vm1153_vm12, %v1403_v23, %v1150_v30 }
0x112a   :  { %v1159_v38 = vsel %vm1156_vm3, %v1158_v36, %v1154_v35  ;;  %v1407_v3 = vpop.eup %1406 }
0x112b   :  { %v1132_v41 = vmul.f32 %v1407_v3, %v1129_v29  ;;  %vm1137_vm6 = vweird.f32 %v1407_v3 }
0x112c   :  { %vm1138_vm9 = vmor %vm1136_vm8, %vm1137_vm6 }
0x112d   :  { %v1133_v42 = vsub.f32 1.0, %v1132_v41 }
0x112f   :  { %v1134_v44 = vmul.f32 %v1407_v3, %v1133_v42 }
0x1131   :  { %v1135_v45 = vadd.f32 %v1407_v3, %v1134_v44 }
0x1133   :  { %v1139_v50 = vsel %vm1138_vm9, %v1407_v3, %v1135_v45 }
0x1134   :  { %v1144_v27 = vsel %vm1141_vm11, %v1143_v32, %v1139_v50 }
0x1135   :  { %v1172_v55 = vmul.f32 %v1167_v7, %v1144_v27 }
0x1171   :  { %v1179_v37 = vpop.permute.xlu2 %1178 }
0x1172   :  { %v1183_v39 = vmul.f32 %v1179_v37, %v1159_v38 }
0x1174   :  { %1188 = vrot.lane.b32.xlu0 %v1183_v39, %s1523_s3 }
0x117c   :  { %1209 = vperm.xlu0 %1280, %v1207_v51  }
0x1184   :  { %946 = vrot.lane.b32.xlu0 %v944_v48, %s1523_s3 }
0x1188   :  { %v1177_v40 = vpop.permute.xlu1 %1176 }
0x1189   :  { %v1182_v52 = vmul.f32 %v1177_v40, %v1144_v27 }
0x118b   :  { %1186 = vrot.lane.b32.xlu2 %v1182_v52, %s1523_s3 }
0x118c   :  { %663 = vrot.lane.b32.xlu0 %v661_v53, %s1524_s12 }
0x1190   :  { %v1169_v54 = vpop.permute.xlu1 %1168 }
0x1191   :  { %v1173_v56 = vmul.f32 %v1169_v54, %v1159_v38 }
0x11e5   :  { %v1187_v57 = vpop.permute.xlu2 %1186 }
0x11e6   :  { %v1192_v58 = vadd.f32 %v1187_v57, %v1172_v55  ;;  %v1189_v59 = vpop.permute.xlu0 %1188 }
0x11e7   :  { %v1193_v60 = vadd.f32 %v1189_v59, %v1173_v56 }
0x11e8   :  { %1408 = vtanh.f32 %v1192_v58 }
0x11e9   :  { %1410 = vtanh.f32 %v1193_v60 }
0x11ee   :  { %v1409_v61 = vpop.eup %1408  ;;  %v1210_v43 = vpop.permute.xlu0 %1209 }
0x11ef   :  { %v1411_v63 = vpop.eup %1410  ;;  %1198 = vrot.lane.b32.xlu1 %v1409_v61, %s1521_s9  ;;  %vm1211_vm7 = vcmp.eq.s32.totalorder %v1210_v43, 1 }
0x11f0   :  { %1200 = vrot.lane.b32.xlu2 %v1411_v63, %s1521_s9 }
0x11f6   :  { %v947_v26 = vpop.permute.xlu0 %946 }
0x11f7   :  { %949 = vst.msk [vmem:[#allocation8 + $0x2] sm:$0x3] %vm378_vm2, %v947_v26 }
0x11f8   :  { %375 = vrot.lane.b32.xlu2 %v373_v31, %s1523_s3 }
0x11fe   :  { %v664_v19 = vpop.permute.xlu0 %663 }
0x1200   :  { %1089 = vrot.lane.b32.xlu2 %v1087_v0, %s1521_s9 }
0x124a   :  { %v1201_v2 = vpop.permute.xlu2 %1200 }
0x124b   :  { %v1205_v9 = vmul.f32 %v1201_v2, %v1159_v38 }
0x124d   :  { %v1215_v1 = vrot.slane %v1205_v9, 6 }
0x1252   :  { %v376_v4 = vpop.permute.xlu2 %375 }
0x1253   :  { %379 = vst.msk [vmem:[#allocation8] sm:$0x3] %vm378_vm2, %v376_v4 }
0x125a   :  { %v1090_v6 = vpop.permute.xlu2 %1089 }
0x125b   :  { %1092 = vst.msk [vmem:[#allocation8 + $0x2] sm:$0x3] %vm522_vm0, %v1090_v6 }
0x1261   :  { %v1199_v13 = vpop.permute.xlu1 %1198 }
0x1262   :  { %v1204_v15 = vmul.f32 %v1199_v13, %v1144_v27 }
0x1264   :  { %v1214_v12 = vrot.slane %v1204_v15, 7 }
0x1266   :  { %v1216_v17 = vsel %vm224_vm10, %v1215_v1, %v1214_v12 }
0x1267   :  { %1217 = vrot.lane.b32.xlu1 %v1216_v17, %s1523_s3 }
0x126f   :  { %519 = vrot.lane.b32.xlu1 %v517_v62, %s1521_s9 }
0x12d9   :  { %v1218_v5 = vpop.permute.xlu1 %1217 }
0x12da   :  { %v1220_v18 = vsel %vm1211_vm7, %v1218_v5, 0.0 }
0x12db   :  { %1222 = vrot.lane.b32.xlu1 %v1220_v18, %s1524_s12 }
0x12e1   :  { %v520_v46 = vpop.permute.xlu1 %519 }
0x12e2   :  { %523 = vst.msk [vmem:[#allocation8] sm:$0x3] %vm522_vm0, %v520_v46 }
0x12e3   :  { %667 = vst.msk [vmem:[#allocation8] sm:$0x3] %vm666_vm14, %v664_v19 }
0x134d   :  { %v1223_v8 = vpop.permute.xlu1 %1222 }
0x134e   :  { %1225 = vst.msk [vmem:[#allocation8 + $0x2] sm:$0x3] %vm666_vm14, %v1223_v8 }
0x134f   :  { %1236 = dma.vmem_to_hbm [thread:$0]  %s1232_s15, 64, %s1234_s18, [#allocation4]  }
0x1350   :  { %1513 = dma.done.wait [#allocation4], 64  }
0x1351   :  { %1514 = vsyncadd [#allocation4], 4294967232 }
0x1352   :  { %1241 = vsyncpa [#allocation3], 1 }
0x1353   :  { %1242 = vsyncpa [#allocation6], 1 }
0x1354   :  { %1243 = vsyncpa [#allocation4], 1 }

</bundles_post_ra>
